<compile_context>
chip_gen: v5e
topology: v5e:2x2
jax: 0.10.0
libtpu: 0.0.40
codegen_flags: <defaults>
</compile_context>

<pallas_src>
import math
import functools

import jax
import jax.numpy as jnp
from jax import lax
from jax.scipy.special import erf as _jax_erf
from jax.experimental import pallas as pl
from jax.experimental.pallas import tpu as pltpu


_PARAM_NAMES = ("wqkv", "bqkv", "wo", "bo", "g1", "be1",
                "w1", "b1", "w2", "b2", "g2", "be2")
_SQRT_HALF = 1.0 / math.sqrt(2.0)


def _erf_poly(x):
    """Abramowitz & Stegun 7.1.26 erf approximation (max abs err ~1.5e-7)."""
    a1, a2, a3, a4, a5 = (0.254829592, -0.284496736, 1.421413741,
                          -1.453152027, 1.061405429)
    p = 0.3275911
    ax = jnp.abs(x)
    t = 1.0 / (1.0 + p * ax)
    poly = ((((a5 * t + a4) * t + a3) * t + a2) * t + a1) * t
    y = 1.0 - poly * jnp.exp(-(ax * ax))
    return jnp.where(x < 0.0, -y, y)


def _gelu_exact(x):
    # nn.GELU() default (exact erf form).
    return 0.5 * x * (1.0 + _erf_poly(x * _SQRT_HALF))


def _layernorm(x, gamma, beta, eps=1e-6):
    mu = jnp.mean(x, axis=-1, keepdims=True)
    var = jnp.mean((x - mu) ** 2, axis=-1, keepdims=True)
    return (x - mu) * lax.rsqrt(var + eps) * gamma + beta


def _encoder_layer_kernel(x_ref,
                          wqkv_ref, bqkv_ref,   # (1,D,3D), (1,1,3D)
                          wo_ref, bo_ref,       # (1,D,D),  (1,1,D)
                          g1_ref, be1_ref,      # (1,1,D)
                          w1_ref, b1_ref,       # (1,D,dff),(1,1,dff)
                          w2_ref, b2_ref,       # (1,dff,D),(1,1,D)
                          g2_ref, be2_ref,      # (1,1,D)
                          o_ref,                # (1,S,D)
                          h_ref,                # VMEM scratch (S,D) f32: layer carry
                          *, n_heads, matmul_dtype):
    l = pl.program_id(1)
    n_layers = pl.num_programs(1)
    _, S, D = x_ref.shape
    dk = D // n_heads
    scale = 1.0 / math.sqrt(dk)
    cdt = matmul_dtype

    # Load this sequence into the resident carry at the first layer.
    @pl.when(l == 0)
    def _():
        h_ref[...] = x_ref[...].reshape(S, D).astype(jnp.float32)

    h = h_ref[...]                                               # (S, D) f32

    wqkv, bqkv = wqkv_ref[0], bqkv_ref[0]
    wo, bo = wo_ref[0], bo_ref[0]
    g1, be1 = g1_ref[0], be1_ref[0]
    w1, b1 = w1_ref[0], b1_ref[0]
    w2, b2 = w2_ref[0], b2_ref[0]
    g2, be2 = g2_ref[0], be2_ref[0]

    # ---- fused Q|K|V projection: one dense MXU matmul -------------------------
    qkv = jnp.dot(h.astype(cdt), wqkv.astype(cdt),
                  preferred_element_type=jnp.float32) + bqkv     # (S, 3D)

    # ---- per-head scaled-dot-product attention (mask=None, exact softmax) -----
    ctx_heads = []
    for hd in range(n_heads):
        qh = qkv[:, hd * dk:(hd + 1) * dk]                        # (S, dk)
        kh = qkv[:, D + hd * dk:D + (hd + 1) * dk]
        vh = qkv[:, 2 * D + hd * dk:2 * D + (hd + 1) * dk]
        s = jnp.einsum('qd,kd->qk', qh.astype(cdt), kh.astype(cdt),
                       preferred_element_type=jnp.float32) * scale
        s = s - jnp.max(s, axis=-1, keepdims=True)
        e = jnp.exp(s)
        p = e / jnp.sum(e, axis=-1, keepdims=True)                # exact softmax
        ctx_heads.append(jnp.dot(p.astype(cdt), vh.astype(cdt),
                                 preferred_element_type=jnp.float32))  # (S, dk)
    ctx = jnp.concatenate(ctx_heads, axis=-1)                     # (S, D) merged heads

    # ---- dense output projection + residual + LayerNorm 1 (dropout=identity) --
    attn = jnp.dot(ctx.astype(cdt), wo.astype(cdt),
                   preferred_element_type=jnp.float32) + bo       # (S, D)
    y = _layernorm(h + attn, g1, be1)

    # ---- feed-forward: Linear -> exact GELU -> Linear, residual + LayerNorm 2 --
    f = jnp.dot(y.astype(cdt), w1.astype(cdt),
                preferred_element_type=jnp.float32) + b1          # (S, dff)
    f = _gelu_exact(f)
    f = jnp.dot(f.astype(cdt), w2.astype(cdt),
                preferred_element_type=jnp.float32) + b2          # (S, D)
    h_new = _layernorm(y + f, g2, be2)

    h_ref[...] = h_new                                            # carry to next layer

    @pl.when(l == n_layers - 1)
    def _():
        o_ref[...] = h_new.reshape(1, S, D).astype(o_ref.dtype)


def transformer_encoder_pallas(x, stacked_params, n_heads, *,
                               matmul_dtype=jnp.float32):
    """Apply L stacked `transformerencoderlayer` forwards in ONE pallas_call.

    x: (B, S, D).  stacked_params[name] has a leading layer axis L; L=1 reproduces a
    single transformerencoderlayer.forward exactly.
    """
    B, S, D = x.shape
    assert D % n_heads == 0
    L = stacked_params["wqkv"].shape[0]
    d_ff = stacked_params["w1"].shape[-1]
    dk = D // n_heads

    kernel = functools.partial(_encoder_layer_kernel,
                               n_heads=n_heads, matmul_dtype=matmul_dtype)

    act_map = lambda b, l: (b, 0, 0)     # activations: one sequence per batch step
    wgt_map = lambda b, l: (l, 0, 0)     # weights: per-layer block (double-buffered)

    in_specs = [
        pl.BlockSpec((1, S, D), act_map),          # x
        pl.BlockSpec((1, D, 3 * D), wgt_map),      # wqkv
        pl.BlockSpec((1, 1, 3 * D), wgt_map),      # bqkv
        pl.BlockSpec((1, D, D), wgt_map),          # wo
        pl.BlockSpec((1, 1, D), wgt_map),          # bo
        pl.BlockSpec((1, 1, D), wgt_map),          # g1
        pl.BlockSpec((1, 1, D), wgt_map),          # be1
        pl.BlockSpec((1, D, d_ff), wgt_map),       # w1
        pl.BlockSpec((1, 1, d_ff), wgt_map),       # b1
        pl.BlockSpec((1, d_ff, D), wgt_map),       # w2
        pl.BlockSpec((1, 1, D), wgt_map),          # b2
        pl.BlockSpec((1, 1, D), wgt_map),          # g2
        pl.BlockSpec((1, 1, D), wgt_map),          # be2
    ]
    out_spec = pl.BlockSpec((1, S, D), act_map)

    # Advisory cost estimate: QKV + scores + PV + out-proj + FFN matmuls per layer.
    flops = L * 2 * B * S * (3 * D * D + 2 * n_heads * S * dk + D * D + 2 * D * d_ff)
    transcendentals = L * B * (n_heads * S * S + S * d_ff)
    weight_bytes = 4 * (3 * D * D + 3 * D + D * D + D + 4 * D
                        + D * d_ff + d_ff + d_ff * D + D)
    bytes_accessed = 2 * B * S * D * 4 + L * weight_bytes

    grid_spec = pltpu.PrefetchScalarGridSpec(
        num_scalar_prefetch=0,
        grid=(B, L),                               # layer axis innermost (carry axis)
        in_specs=in_specs,
        out_specs=out_spec,
        scratch_shapes=[pltpu.VMEM((S, D), jnp.float32)],
    )

    return pl.pallas_call(
        kernel,
        out_shape=jax.ShapeDtypeStruct((B, S, D), x.dtype),
        grid_spec=grid_spec,
        compiler_params=pltpu.CompilerParams(
            dimension_semantics=("parallel", "arbitrary"),
            vmem_limit_bytes=64 * 1024 * 1024),
        cost_estimate=pl.CostEstimate(flops=flops,
                                      transcendentals=transcendentals,
                                      bytes_accessed=bytes_accessed),
    )(x, *[stacked_params[n] for n in _PARAM_NAMES])


def init_layer_params(key, d_model, d_ff, n_heads):
    """Random weights in the kernel layout (Linear weights stored as (in, out))."""
    ks = jax.random.split(key, 6)
    std = 0.02

    def lin(k, fan_in, fan_out):
        kw, kb = jax.random.split(k)
        w = jax.random.normal(kw, (fan_in, fan_out), jnp.float32) * std
        b = jax.random.normal(kb, (1, fan_out), jnp.float32) * std
        return w, b

    wq, bq = lin(ks[0], d_model, d_model)
    wk, bk = lin(ks[1], d_model, d_model)
    wv, bv = lin(ks[2], d_model, d_model)
    wo, bo = lin(ks[3], d_model, d_model)
    w1, b1 = lin(ks[4], d_model, d_ff)
    w2, b2 = lin(ks[5], d_ff, d_model)

    return dict(
        wqkv=jnp.concatenate([wq, wk, wv], axis=-1),   # (D, 3D): columns [Q | K | V]
        bqkv=jnp.concatenate([bq, bk, bv], axis=-1),   # (1, 3D)
        wo=wo, bo=bo,
        g1=jnp.ones((1, d_model), jnp.float32), be1=jnp.zeros((1, d_model), jnp.float32),
        w1=w1, b1=b1, w2=w2, b2=b2,
        g2=jnp.ones((1, d_model), jnp.float32), be2=jnp.zeros((1, d_model), jnp.float32),
    )


def stack_layer_params(per_layer):
    """Stack per-layer param dicts along a leading layer axis for the layer grid."""
    return {k: jnp.stack([p[k] for p in per_layer], axis=0) for k in _PARAM_NAMES}


def encoder_reference(x, stacked_params, n_heads):
    """Pure-JAX mirror of the PyTorch transformerencoderlayer stack (eval mode)."""
    B, S, D = x.shape
    L = stacked_params["wqkv"].shape[0]
    dk = D // n_heads

    def layernorm(v, g, b):
        mu = jnp.mean(v, axis=-1, keepdims=True)
        var = jnp.mean((v - mu) ** 2, axis=-1, keepdims=True)
        return (v - mu) / jnp.sqrt(var + 1e-6) * g + b

    h = x.astype(jnp.float32)
    for l in range(L):
        wqkv = stacked_params["wqkv"][l]
        bqkv = stacked_params["bqkv"][l][0]
        q = h @ wqkv[:, :D] + bqkv[:D]
        k = h @ wqkv[:, D:2 * D] + bqkv[D:2 * D]
        v = h @ wqkv[:, 2 * D:] + bqkv[2 * D:]
        split = lambda t: t.reshape(B, S, n_heads, dk).transpose(0, 2, 1, 3)
        Q, K, V = split(q), split(k), split(v)
        scores = jnp.einsum('bhqd,bhkd->bhqk', Q, K) / math.sqrt(dk)
        p = jax.nn.softmax(scores, axis=-1)
        ctx = jnp.einsum('bhqk,bhkd->bhqd', p, V).transpose(0, 2, 1, 3).reshape(B, S, D)
        attn = ctx @ stacked_params["wo"][l] + stacked_params["bo"][l][0]
        y = layernorm(h + attn, stacked_params["g1"][l][0], stacked_params["be1"][l][0])
        f = y @ stacked_params["w1"][l] + stacked_params["b1"][l][0]
        f = 0.5 * f * (1.0 + _jax_erf(f * _SQRT_HALF))             # exact erf GELU
        f = f @ stacked_params["w2"][l] + stacked_params["b2"][l][0]
        h = layernorm(y + f, stacked_params["g2"][l][0], stacked_params["be2"][l][0])
    return h


if __name__ == "__main__":
    # Module hyperparameters (mask=None; dropout is identity / eval mode).
    n_layer, d_model, d_ff, n_heads = 2, 32, 64, 4
    B, S = 2, 8

    root = jax.random.PRNGKey(0)
    k_x, k_p = jax.random.split(root)
    x = jax.random.normal(k_x, (B, S, d_model), jnp.float32)

    layer_keys = jax.random.split(k_p, n_layer)
    params = stack_layer_params(
        [init_layer_params(layer_keys[i], d_model, d_ff, n_heads)
         for i in range(n_layer)])

    # f32 matmuls for exact parity with the f32 PyTorch reference; pass
    # matmul_dtype=jnp.bfloat16 on v6e/v7x for MXU-native throughput.
    out = transformer_encoder_pallas(x, params, n_heads, matmul_dtype=jnp.float32)
    out = jax.block_until_ready(out)
    assert out.shape == (B, S, d_model)

    ref = encoder_reference(x, params, n_heads)
    err = float(jnp.max(jnp.abs(out.astype(jnp.float32) - ref)))
    assert err < 1e-3, f"max abs error vs reference: {err}"
    print("KERNEL_OK")
</pallas_src>

<mosaic_0001>
module attributes {stable_mosaic.version = 11 : i64} {
  func.func @_encoder_layer_kernel(%arg0: i32, %arg1: i32, %arg2: memref<1x8x32xf32, #tpu.memory_space<vmem>>, %arg3: memref<1x32x96xf32, #tpu.memory_space<vmem>>, %arg4: memref<1x1x96xf32, #tpu.memory_space<vmem>>, %arg5: memref<1x32x32xf32, #tpu.memory_space<vmem>>, %arg6: memref<1x1x32xf32, #tpu.memory_space<vmem>>, %arg7: memref<1x1x32xf32, #tpu.memory_space<vmem>>, %arg8: memref<1x1x32xf32, #tpu.memory_space<vmem>>, %arg9: memref<1x32x64xf32, #tpu.memory_space<vmem>>, %arg10: memref<1x1x64xf32, #tpu.memory_space<vmem>>, %arg11: memref<1x64x32xf32, #tpu.memory_space<vmem>>, %arg12: memref<1x1x32xf32, #tpu.memory_space<vmem>>, %arg13: memref<1x1x32xf32, #tpu.memory_space<vmem>>, %arg14: memref<1x1x32xf32, #tpu.memory_space<vmem>>, %arg15: memref<1x8x32xf32, #tpu.memory_space<vmem>>, %arg16: memref<8x32xf32, #tpu.memory_space<vmem>>) attributes {dimension_semantics = [#tpu.dimension_semantics<parallel>, #tpu.dimension_semantics<arbitrary>], iteration_bounds = array<i64: 2, 2>, scalar_prefetch = 0 : i64, scratch_operands = 1 : i64, tpu.core_type = #tpu.core_type<tc>, window_params = [{transform_indices = @transform_0, window_bounds = array<i64: 1, 8, 32>}, {transform_indices = @transform_1, window_bounds = array<i64: 1, 32, 96>}, {transform_indices = @transform_2, window_bounds = array<i64: 1, 1, 96>}, {transform_indices = @transform_3, window_bounds = array<i64: 1, 32, 32>}, {transform_indices = @transform_4, window_bounds = array<i64: 1, 1, 32>}, {transform_indices = @transform_5, window_bounds = array<i64: 1, 1, 32>}, {transform_indices = @transform_6, window_bounds = array<i64: 1, 1, 32>}, {transform_indices = @transform_7, window_bounds = array<i64: 1, 32, 64>}, {transform_indices = @transform_8, window_bounds = array<i64: 1, 1, 64>}, {transform_indices = @transform_9, window_bounds = array<i64: 1, 64, 32>}, {transform_indices = @transform_10, window_bounds = array<i64: 1, 1, 32>}, {transform_indices = @transform_11, window_bounds = array<i64: 1, 1, 32>}, {transform_indices = @transform_12, window_bounds = array<i64: 1, 1, 32>}, {transform_indices = @transform_13, window_bounds = array<i64: 1, 8, 32>}]} {
    %c0_i32 = arith.constant 0 : i32
    %0 = arith.cmpi eq, %arg1, %c0_i32 : i32
    %1 = arith.extui %0 : i1 to i32
    %c0_i32_0 = arith.constant 0 : i32
    %2 = arith.cmpi ne, %1, %c0_i32_0 : i32
    scf.if %2 {
      %c0_89 = arith.constant 0 : index
      %c0_90 = arith.constant 0 : index
      %c0_91 = arith.constant 0 : index
      %195 = vector.load %arg2[%c0_89, %c0_90, %c0_91] : memref<1x8x32xf32, #tpu.memory_space<vmem>>, vector<1x8x32xf32>
      %196 = vector.shape_cast %195 : vector<1x8x32xf32> to vector<8x32xf32>
      %c0_92 = arith.constant 0 : index
      %c0_93 = arith.constant 0 : index
      %197 = vector.load %arg16[%c0_92, %c0_93] : memref<8x32xf32, #tpu.memory_space<vmem>>, vector<8x32xf32>
      tpu.vector_store %arg16[%c0_92, %c0_93], %196 {strides = array<i32>} : memref<8x32xf32, #tpu.memory_space<vmem>>, vector<8x32xf32>,
    } else {
    }
    %c0 = arith.constant 0 : index
    %c0_1 = arith.constant 0 : index
    %3 = vector.load %arg16[%c0, %c0_1] : memref<8x32xf32, #tpu.memory_space<vmem>>, vector<8x32xf32>
    %c0_2 = arith.constant 0 : index
    %c0_3 = arith.constant 0 : index
    %c0_4 = arith.constant 0 : index
    %4 = vector.load %arg3[%c0_2, %c0_3, %c0_4] : memref<1x32x96xf32, #tpu.memory_space<vmem>>, vector<1x32x96xf32>
    %5 = vector.shape_cast %4 : vector<1x32x96xf32> to vector<32x96xf32>
    %c0_5 = arith.constant 0 : index
    %c0_6 = arith.constant 0 : index
    %c0_7 = arith.constant 0 : index
    %6 = vector.load %arg4[%c0_5, %c0_6, %c0_7] : memref<1x1x96xf32, #tpu.memory_space<vmem>>, vector<1x1x96xf32>
    %7 = vector.shape_cast %6 : vector<1x1x96xf32> to vector<1x96xf32>
    %c0_8 = arith.constant 0 : index
    %c0_9 = arith.constant 0 : index
    %c0_10 = arith.constant 0 : index
    %8 = vector.load %arg5[%c0_8, %c0_9, %c0_10] : memref<1x32x32xf32, #tpu.memory_space<vmem>>, vector<1x32x32xf32>
    %9 = vector.shape_cast %8 : vector<1x32x32xf32> to vector<32x32xf32>
    %c0_11 = arith.constant 0 : index
    %c0_12 = arith.constant 0 : index
    %c0_13 = arith.constant 0 : index
    %10 = vector.load %arg6[%c0_11, %c0_12, %c0_13] : memref<1x1x32xf32, #tpu.memory_space<vmem>>, vector<1x1x32xf32>
    %11 = vector.shape_cast %10 : vector<1x1x32xf32> to vector<1x32xf32>
    %c0_14 = arith.constant 0 : index
    %c0_15 = arith.constant 0 : index
    %c0_16 = arith.constant 0 : index
    %12 = vector.load %arg7[%c0_14, %c0_15, %c0_16] : memref<1x1x32xf32, #tpu.memory_space<vmem>>, vector<1x1x32xf32>
    %13 = vector.shape_cast %12 : vector<1x1x32xf32> to vector<1x32xf32>
    %c0_17 = arith.constant 0 : index
    %c0_18 = arith.constant 0 : index
    %c0_19 = arith.constant 0 : index
    %14 = vector.load %arg8[%c0_17, %c0_18, %c0_19] : memref<1x1x32xf32, #tpu.memory_space<vmem>>, vector<1x1x32xf32>
    %15 = vector.shape_cast %14 : vector<1x1x32xf32> to vector<1x32xf32>
    %c0_20 = arith.constant 0 : index
    %c0_21 = arith.constant 0 : index
    %c0_22 = arith.constant 0 : index
    %16 = vector.load %arg9[%c0_20, %c0_21, %c0_22] : memref<1x32x64xf32, #tpu.memory_space<vmem>>, vector<1x32x64xf32>
    %17 = vector.shape_cast %16 : vector<1x32x64xf32> to vector<32x64xf32>
    %c0_23 = arith.constant 0 : index
    %c0_24 = arith.constant 0 : index
    %c0_25 = arith.constant 0 : index
    %18 = vector.load %arg10[%c0_23, %c0_24, %c0_25] : memref<1x1x64xf32, #tpu.memory_space<vmem>>, vector<1x1x64xf32>
    %19 = vector.shape_cast %18 : vector<1x1x64xf32> to vector<1x64xf32>
    %c0_26 = arith.constant 0 : index
    %c0_27 = arith.constant 0 : index
    %c0_28 = arith.constant 0 : index
    %20 = vector.load %arg11[%c0_26, %c0_27, %c0_28] : memref<1x64x32xf32, #tpu.memory_space<vmem>>, vector<1x64x32xf32>
    %21 = vector.shape_cast %20 : vector<1x64x32xf32> to vector<64x32xf32>
    %c0_29 = arith.constant 0 : index
    %c0_30 = arith.constant 0 : index
    %c0_31 = arith.constant 0 : index
    %22 = vector.load %arg12[%c0_29, %c0_30, %c0_31] : memref<1x1x32xf32, #tpu.memory_space<vmem>>, vector<1x1x32xf32>
    %23 = vector.shape_cast %22 : vector<1x1x32xf32> to vector<1x32xf32>
    %c0_32 = arith.constant 0 : index
    %c0_33 = arith.constant 0 : index
    %c0_34 = arith.constant 0 : index
    %24 = vector.load %arg13[%c0_32, %c0_33, %c0_34] : memref<1x1x32xf32, #tpu.memory_space<vmem>>, vector<1x1x32xf32>
    %25 = vector.shape_cast %24 : vector<1x1x32xf32> to vector<1x32xf32>
    %c0_35 = arith.constant 0 : index
    %c0_36 = arith.constant 0 : index
    %c0_37 = arith.constant 0 : index
    %26 = vector.load %arg14[%c0_35, %c0_36, %c0_37] : memref<1x1x32xf32, #tpu.memory_space<vmem>>, vector<1x1x32xf32>
    %27 = vector.shape_cast %26 : vector<1x1x32xf32> to vector<1x32xf32>
    %cst = arith.constant dense<0.000000e+00> : vector<8x96xf32>
    %28 = tpu.matmul %3, %5, %cst {dimension_numbers = #tpu.dot_dimension_numbers<[1], [0], [0], [1], [0, 0, 1, 1], [], []>} : vector<8x32xf32>, vector<32x96xf32>, vector<8x96xf32> -> vector<8x96xf32>
    %29 = vector.broadcast %7 : vector<1x96xf32> to vector<8x96xf32>
    %30 = arith.addf %28, %29 : vector<8x96xf32>
    %31 = vector.extract_strided_slice %30 {offsets = [0, 0], sizes = [8, 8], strides = [1, 1]} : vector<8x96xf32> to vector<8x8xf32>
    %32 = vector.extract_strided_slice %30 {offsets = [0, 32], sizes = [8, 8], strides = [1, 1]} : vector<8x96xf32> to vector<8x8xf32>
    %33 = vector.extract_strided_slice %30 {offsets = [0, 64], sizes = [8, 8], strides = [1, 1]} : vector<8x96xf32> to vector<8x8xf32>
    "tpu.trace_start"() <{level = 10 : i32, message = "qd,kd->qk"}> : () -> ()
    %cst_38 = arith.constant dense<0.000000e+00> : vector<8x8xf32>
    %34 = tpu.matmul %31, %32, %cst_38 {dimension_numbers = #tpu.dot_dimension_numbers<[1], [1], [0], [0], [0, 0, 1, 0], [], []>} : vector<8x8xf32>, vector<8x8xf32>, vector<8x8xf32> -> vector<8x8xf32>
    "tpu.trace_stop"() : () -> ()
    %cst_39 = arith.constant 0.353553385 : f32
    %35 = vector.broadcast %cst_39 : f32 to vector<8x8xf32>
    %36 = arith.mulf %34, %35 : vector<8x8xf32>
    %cst_40 = arith.constant dense<0xFF800000> : vector<8xf32>
    %37 = vector.multi_reduction <maximumf>, %36, %cst_40 [1] : vector<8x8xf32> to vector<8xf32>
    %38 = vector.shape_cast %37 : vector<8xf32> to vector<8x1xf32>
    %39 = vector.broadcast %38 : vector<8x1xf32> to vector<8x8xf32>
    %40 = arith.subf %36, %39 : vector<8x8xf32>
    %41 = math.exp %40 : vector<8x8xf32>
    %cst_41 = arith.constant dense<0.000000e+00> : vector<8xf32>
    %42 = vector.multi_reduction <add>, %41, %cst_41 [1] : vector<8x8xf32> to vector<8xf32>
    %43 = vector.shape_cast %42 : vector<8xf32> to vector<8x1xf32>
    %44 = vector.broadcast %43 : vector<8x1xf32> to vector<8x8xf32>
    %45 = arith.divf %41, %44 : vector<8x8xf32>
    %cst_42 = arith.constant dense<0.000000e+00> : vector<8x8xf32>
    %46 = tpu.matmul %45, %33, %cst_42 {dimension_numbers = #tpu.dot_dimension_numbers<[1], [0], [0], [1], [0, 0, 1, 1], [], []>} : vector<8x8xf32>, vector<8x8xf32>, vector<8x8xf32> -> vector<8x8xf32>
    %47 = vector.extract_strided_slice %30 {offsets = [0, 8], sizes = [8, 8], strides = [1, 1]} : vector<8x96xf32> to vector<8x8xf32>
    %48 = vector.extract_strided_slice %30 {offsets = [0, 40], sizes = [8, 8], strides = [1, 1]} : vector<8x96xf32> to vector<8x8xf32>
    %49 = vector.extract_strided_slice %30 {offsets = [0, 72], sizes = [8, 8], strides = [1, 1]} : vector<8x96xf32> to vector<8x8xf32>
    "tpu.trace_start"() <{level = 10 : i32, message = "qd,kd->qk"}> : () -> ()
    %cst_43 = arith.constant dense<0.000000e+00> : vector<8x8xf32>
    %50 = tpu.matmul %47, %48, %cst_43 {dimension_numbers = #tpu.dot_dimension_numbers<[1], [1], [0], [0], [0, 0, 1, 0], [], []>} : vector<8x8xf32>, vector<8x8xf32>, vector<8x8xf32> -> vector<8x8xf32>
    "tpu.trace_stop"() : () -> ()
    %cst_44 = arith.constant 0.353553385 : f32
    %51 = vector.broadcast %cst_44 : f32 to vector<8x8xf32>
    %52 = arith.mulf %50, %51 : vector<8x8xf32>
    %cst_45 = arith.constant dense<0xFF800000> : vector<8xf32>
    %53 = vector.multi_reduction <maximumf>, %52, %cst_45 [1] : vector<8x8xf32> to vector<8xf32>
    %54 = vector.shape_cast %53 : vector<8xf32> to vector<8x1xf32>
    %55 = vector.broadcast %54 : vector<8x1xf32> to vector<8x8xf32>
    %56 = arith.subf %52, %55 : vector<8x8xf32>
    %57 = math.exp %56 : vector<8x8xf32>
    %cst_46 = arith.constant dense<0.000000e+00> : vector<8xf32>
    %58 = vector.multi_reduction <add>, %57, %cst_46 [1] : vector<8x8xf32> to vector<8xf32>
    %59 = vector.shape_cast %58 : vector<8xf32> to vector<8x1xf32>
    %60 = vector.broadcast %59 : vector<8x1xf32> to vector<8x8xf32>
    %61 = arith.divf %57, %60 : vector<8x8xf32>
    %cst_47 = arith.constant dense<0.000000e+00> : vector<8x8xf32>
    %62 = tpu.matmul %61, %49, %cst_47 {dimension_numbers = #tpu.dot_dimension_numbers<[1], [0], [0], [1], [0, 0, 1, 1], [], []>} : vector<8x8xf32>, vector<8x8xf32>, vector<8x8xf32> -> vector<8x8xf32>
    %63 = vector.extract_strided_slice %30 {offsets = [0, 16], sizes = [8, 8], strides = [1, 1]} : vector<8x96xf32> to vector<8x8xf32>
    %64 = vector.extract_strided_slice %30 {offsets = [0, 48], sizes = [8, 8], strides = [1, 1]} : vector<8x96xf32> to vector<8x8xf32>
    %65 = vector.extract_strided_slice %30 {offsets = [0, 80], sizes = [8, 8], strides = [1, 1]} : vector<8x96xf32> to vector<8x8xf32>
    "tpu.trace_start"() <{level = 10 : i32, message = "qd,kd->qk"}> : () -> ()
    %cst_48 = arith.constant dense<0.000000e+00> : vector<8x8xf32>
    %66 = tpu.matmul %63, %64, %cst_48 {dimension_numbers = #tpu.dot_dimension_numbers<[1], [1], [0], [0], [0, 0, 1, 0], [], []>} : vector<8x8xf32>, vector<8x8xf32>, vector<8x8xf32> -> vector<8x8xf32>
    "tpu.trace_stop"() : () -> ()
    %cst_49 = arith.constant 0.353553385 : f32
    %67 = vector.broadcast %cst_49 : f32 to vector<8x8xf32>
    %68 = arith.mulf %66, %67 : vector<8x8xf32>
    %cst_50 = arith.constant dense<0xFF800000> : vector<8xf32>
    %69 = vector.multi_reduction <maximumf>, %68, %cst_50 [1] : vector<8x8xf32> to vector<8xf32>
    %70 = vector.shape_cast %69 : vector<8xf32> to vector<8x1xf32>
    %71 = vector.broadcast %70 : vector<8x1xf32> to vector<8x8xf32>
    %72 = arith.subf %68, %71 : vector<8x8xf32>
    %73 = math.exp %72 : vector<8x8xf32>
    %cst_51 = arith.constant dense<0.000000e+00> : vector<8xf32>
    %74 = vector.multi_reduction <add>, %73, %cst_51 [1] : vector<8x8xf32> to vector<8xf32>
    %75 = vector.shape_cast %74 : vector<8xf32> to vector<8x1xf32>
    %76 = vector.broadcast %75 : vector<8x1xf32> to vector<8x8xf32>
    %77 = arith.divf %73, %76 : vector<8x8xf32>
    %cst_52 = arith.constant dense<0.000000e+00> : vector<8x8xf32>
    %78 = tpu.matmul %77, %65, %cst_52 {dimension_numbers = #tpu.dot_dimension_numbers<[1], [0], [0], [1], [0, 0, 1, 1], [], []>} : vector<8x8xf32>, vector<8x8xf32>, vector<8x8xf32> -> vector<8x8xf32>
    %79 = vector.extract_strided_slice %30 {offsets = [0, 24], sizes = [8, 8], strides = [1, 1]} : vector<8x96xf32> to vector<8x8xf32>
    %80 = vector.extract_strided_slice %30 {offsets = [0, 56], sizes = [8, 8], strides = [1, 1]} : vector<8x96xf32> to vector<8x8xf32>
    %81 = vector.extract_strided_slice %30 {offsets = [0, 88], sizes = [8, 8], strides = [1, 1]} : vector<8x96xf32> to vector<8x8xf32>
    "tpu.trace_start"() <{level = 10 : i32, message = "qd,kd->qk"}> : () -> ()
    %cst_53 = arith.constant dense<0.000000e+00> : vector<8x8xf32>
    %82 = tpu.matmul %79, %80, %cst_53 {dimension_numbers = #tpu.dot_dimension_numbers<[1], [1], [0], [0], [0, 0, 1, 0], [], []>} : vector<8x8xf32>, vector<8x8xf32>, vector<8x8xf32> -> vector<8x8xf32>
    "tpu.trace_stop"() : () -> ()
    %cst_54 = arith.constant 0.353553385 : f32
    %83 = vector.broadcast %cst_54 : f32 to vector<8x8xf32>
    %84 = arith.mulf %82, %83 : vector<8x8xf32>
    %cst_55 = arith.constant dense<0xFF800000> : vector<8xf32>
    %85 = vector.multi_reduction <maximumf>, %84, %cst_55 [1] : vector<8x8xf32> to vector<8xf32>
    %86 = vector.shape_cast %85 : vector<8xf32> to vector<8x1xf32>
    %87 = vector.broadcast %86 : vector<8x1xf32> to vector<8x8xf32>
    %88 = arith.subf %84, %87 : vector<8x8xf32>
    %89 = math.exp %88 : vector<8x8xf32>
    %cst_56 = arith.constant dense<0.000000e+00> : vector<8xf32>
    %90 = vector.multi_reduction <add>, %89, %cst_56 [1] : vector<8x8xf32> to vector<8xf32>
    %91 = vector.shape_cast %90 : vector<8xf32> to vector<8x1xf32>
    %92 = vector.broadcast %91 : vector<8x1xf32> to vector<8x8xf32>
    %93 = arith.divf %89, %92 : vector<8x8xf32>
    %cst_57 = arith.constant dense<0.000000e+00> : vector<8x8xf32>
    %94 = tpu.matmul %93, %81, %cst_57 {dimension_numbers = #tpu.dot_dimension_numbers<[1], [0], [0], [1], [0, 0, 1, 1], [], []>} : vector<8x8xf32>, vector<8x8xf32>, vector<8x8xf32> -> vector<8x8xf32>
    %95 = tpu.concatenate %46, %62, %78, %94 in 1 : vector<8x8xf32>, vector<8x8xf32>, vector<8x8xf32>, vector<8x8xf32> -> vector<8x32xf32>
    %cst_58 = arith.constant dense<0.000000e+00> : vector<8x32xf32>
    %96 = tpu.matmul %95, %9, %cst_58 {dimension_numbers = #tpu.dot_dimension_numbers<[1], [0], [0], [1], [0, 0, 1, 1], [], []>} : vector<8x32xf32>, vector<32x32xf32>, vector<8x32xf32> -> vector<8x32xf32>
    %97 = vector.broadcast %11 : vector<1x32xf32> to vector<8x32xf32>
    %98 = arith.addf %96, %97 : vector<8x32xf32>
    %99 = arith.addf %3, %98 : vector<8x32xf32>
    %cst_59 = arith.constant dense<0.000000e+00> : vector<8xf32>
    %100 = vector.multi_reduction <add>, %99, %cst_59 [1] : vector<8x32xf32> to vector<8xf32>
    %101 = vector.shape_cast %100 : vector<8xf32> to vector<8x1xf32>
    %cst_60 = arith.constant 3.200000e+01 : f32
    %102 = vector.broadcast %cst_60 : f32 to vector<8x1xf32>
    %103 = arith.divf %101, %102 : vector<8x1xf32>
    %104 = vector.broadcast %103 : vector<8x1xf32> to vector<8x32xf32>
    %105 = arith.subf %99, %104 : vector<8x32xf32>
    %106 = arith.mulf %105, %105 : vector<8x32xf32>
    %cst_61 = arith.constant dense<0.000000e+00> : vector<8xf32>
    %107 = vector.multi_reduction <add>, %106, %cst_61 [1] : vector<8x32xf32> to vector<8xf32>
    %108 = vector.shape_cast %107 : vector<8xf32> to vector<8x1xf32>
    %cst_62 = arith.constant 3.200000e+01 : f32
    %109 = vector.broadcast %cst_62 : f32 to vector<8x1xf32>
    %110 = arith.divf %108, %109 : vector<8x1xf32>
    %111 = vector.broadcast %103 : vector<8x1xf32> to vector<8x32xf32>
    %112 = arith.subf %99, %111 : vector<8x32xf32>
    %cst_63 = arith.constant 9.99999997E-7 : f32
    %113 = vector.broadcast %cst_63 : f32 to vector<8x1xf32>
    %114 = arith.addf %110, %113 : vector<8x1xf32>
    %115 = math.rsqrt %114 : vector<8x1xf32>
    %116 = vector.broadcast %115 : vector<8x1xf32> to vector<8x32xf32>
    %117 = arith.mulf %112, %116 : vector<8x32xf32>
    %118 = vector.broadcast %13 : vector<1x32xf32> to vector<8x32xf32>
    %119 = arith.mulf %117, %118 : vector<8x32xf32>
    %120 = vector.broadcast %15 : vector<1x32xf32> to vector<8x32xf32>
    %121 = arith.addf %119, %120 : vector<8x32xf32>
    %cst_64 = arith.constant dense<0.000000e+00> : vector<8x64xf32>
    %122 = tpu.matmul %121, %17, %cst_64 {dimension_numbers = #tpu.dot_dimension_numbers<[1], [0], [0], [1], [0, 0, 1, 1], [], []>} : vector<8x32xf32>, vector<32x64xf32>, vector<8x64xf32> -> vector<8x64xf32>
    %123 = vector.broadcast %19 : vector<1x64xf32> to vector<8x64xf32>
    %124 = arith.addf %122, %123 : vector<8x64xf32>
    %cst_65 = arith.constant 5.000000e-01 : f32
    %125 = vector.broadcast %cst_65 : f32 to vector<8x64xf32>
    %126 = arith.mulf %125, %124 : vector<8x64xf32>
    %cst_66 = arith.constant 0.707106769 : f32
    %127 = vector.broadcast %cst_66 : f32 to vector<8x64xf32>
    %128 = arith.mulf %124, %127 : vector<8x64xf32>
    %129 = math.absf %128 : vector<8x64xf32>
    %cst_67 = arith.constant 0.327591091 : f32
    %130 = vector.broadcast %cst_67 : f32 to vector<8x64xf32>
    %131 = arith.mulf %130, %129 : vector<8x64xf32>
    %cst_68 = arith.constant 1.000000e+00 : f32
    %132 = vector.broadcast %cst_68 : f32 to vector<8x64xf32>
    %133 = arith.addf %132, %131 : vector<8x64xf32>
    %cst_69 = arith.constant 1.000000e+00 : f32
    %134 = vector.broadcast %cst_69 : f32 to vector<8x64xf32>
    %135 = arith.divf %134, %133 : vector<8x64xf32>
    %cst_70 = arith.constant 1.06140542 : f32
    %136 = vector.broadcast %cst_70 : f32 to vector<8x64xf32>
    %137 = arith.mulf %136, %135 : vector<8x64xf32>
    %cst_71 = arith.constant -1.45315206 : f32
    %138 = vector.broadcast %cst_71 : f32 to vector<8x64xf32>
    %139 = arith.addf %137, %138 : vector<8x64xf32>
    %140 = arith.mulf %139, %135 : vector<8x64xf32>
    %cst_72 = arith.constant 1.42141378 : f32
    %141 = vector.broadcast %cst_72 : f32 to vector<8x64xf32>
    %142 = arith.addf %140, %141 : vector<8x64xf32>
    %143 = arith.mulf %142, %135 : vector<8x64xf32>
    %cst_73 = arith.constant -0.284496725 : f32
    %144 = vector.broadcast %cst_73 : f32 to vector<8x64xf32>
    %145 = arith.addf %143, %144 : vector<8x64xf32>
    %146 = arith.mulf %145, %135 : vector<8x64xf32>
    %cst_74 = arith.constant 0.254829586 : f32
    %147 = vector.broadcast %cst_74 : f32 to vector<8x64xf32>
    %148 = arith.addf %146, %147 : vector<8x64xf32>
    %149 = arith.mulf %148, %135 : vector<8x64xf32>
    %150 = arith.mulf %129, %129 : vector<8x64xf32>
    %cst_75 = arith.constant 0.000000e+00 : f32
    %151 = vector.broadcast %cst_75 : f32 to vector<8x64xf32>
    %152 = arith.subf %151, %150 : vector<8x64xf32>
    %153 = math.exp %152 : vector<8x64xf32>
    %154 = arith.mulf %149, %153 : vector<8x64xf32>
    %cst_76 = arith.constant 1.000000e+00 : f32
    %155 = vector.broadcast %cst_76 : f32 to vector<8x64xf32>
    %156 = arith.subf %155, %154 : vector<8x64xf32>
    %cst_77 = arith.constant 0.000000e+00 : f32
    %157 = vector.broadcast %cst_77 : f32 to vector<8x64xf32>
    %158 = arith.cmpf olt, %128, %157 : vector<8x64xf32>
    %cst_78 = arith.constant 0.000000e+00 : f32
    %159 = vector.broadcast %cst_78 : f32 to vector<8x64xf32>
    %160 = arith.subf %159, %156 : vector<8x64xf32>
    %161 = arith.select %158, %160, %156 : vector<8x64xi1>, vector<8x64xf32>
    %cst_79 = arith.constant 1.000000e+00 : f32
    %162 = vector.broadcast %cst_79 : f32 to vector<8x64xf32>
    %163 = arith.addf %162, %161 : vector<8x64xf32>
    %164 = arith.mulf %126, %163 : vector<8x64xf32>
    %cst_80 = arith.constant dense<0.000000e+00> : vector<8x32xf32>
    %165 = tpu.matmul %164, %21, %cst_80 {dimension_numbers = #tpu.dot_dimension_numbers<[1], [0], [0], [1], [0, 0, 1, 1], [], []>} : vector<8x64xf32>, vector<64x32xf32>, vector<8x32xf32> -> vector<8x32xf32>
    %166 = vector.broadcast %23 : vector<1x32xf32> to vector<8x32xf32>
    %167 = arith.addf %165, %166 : vector<8x32xf32>
    %168 = arith.addf %121, %167 : vector<8x32xf32>
    %cst_81 = arith.constant dense<0.000000e+00> : vector<8xf32>
    %169 = vector.multi_reduction <add>, %168, %cst_81 [1] : vector<8x32xf32> to vector<8xf32>
    %170 = vector.shape_cast %169 : vector<8xf32> to vector<8x1xf32>
    %cst_82 = arith.constant 3.200000e+01 : f32
    %171 = vector.broadcast %cst_82 : f32 to vector<8x1xf32>
    %172 = arith.divf %170, %171 : vector<8x1xf32>
    %173 = vector.broadcast %172 : vector<8x1xf32> to vector<8x32xf32>
    %174 = arith.subf %168, %173 : vector<8x32xf32>
    %175 = arith.mulf %174, %174 : vector<8x32xf32>
    %cst_83 = arith.constant dense<0.000000e+00> : vector<8xf32>
    %176 = vector.multi_reduction <add>, %175, %cst_83 [1] : vector<8x32xf32> to vector<8xf32>
    %177 = vector.shape_cast %176 : vector<8xf32> to vector<8x1xf32>
    %cst_84 = arith.constant 3.200000e+01 : f32
    %178 = vector.broadcast %cst_84 : f32 to vector<8x1xf32>
    %179 = arith.divf %177, %178 : vector<8x1xf32>
    %180 = vector.broadcast %172 : vector<8x1xf32> to vector<8x32xf32>
    %181 = arith.subf %168, %180 : vector<8x32xf32>
    %cst_85 = arith.constant 9.99999997E-7 : f32
    %182 = vector.broadcast %cst_85 : f32 to vector<8x1xf32>
    %183 = arith.addf %179, %182 : vector<8x1xf32>
    %184 = math.rsqrt %183 : vector<8x1xf32>
    %185 = vector.broadcast %184 : vector<8x1xf32> to vector<8x32xf32>
    %186 = arith.mulf %181, %185 : vector<8x32xf32>
    %187 = vector.broadcast %25 : vector<1x32xf32> to vector<8x32xf32>
    %188 = arith.mulf %186, %187 : vector<8x32xf32>
    %189 = vector.broadcast %27 : vector<1x32xf32> to vector<8x32xf32>
    %190 = arith.addf %188, %189 : vector<8x32xf32>
    %c0_86 = arith.constant 0 : index
    %c0_87 = arith.constant 0 : index
    %191 = vector.load %arg16[%c0_86, %c0_87] : memref<8x32xf32, #tpu.memory_space<vmem>>, vector<8x32xf32>
    tpu.vector_store %arg16[%c0_86, %c0_87], %190 {strides = array<i32>} : memref<8x32xf32, #tpu.memory_space<vmem>>, vector<8x32xf32>,
    %c1_i32 = arith.constant 1 : i32
    %192 = arith.cmpi eq, %arg1, %c1_i32 : i32
    %193 = arith.extui %192 : i1 to i32
    %c0_i32_88 = arith.constant 0 : i32
    %194 = arith.cmpi ne, %193, %c0_i32_88 : i32
    scf.if %194 {
      %195 = vector.shape_cast %190 : vector<8x32xf32> to vector<1x8x32xf32>
      %c0_89 = arith.constant 0 : index
      %c0_90 = arith.constant 0 : index
      %c0_91 = arith.constant 0 : index
      %196 = vector.load %arg15[%c0_89, %c0_90, %c0_91] : memref<1x8x32xf32, #tpu.memory_space<vmem>>, vector<1x8x32xf32>
      tpu.vector_store %arg15[%c0_89, %c0_90, %c0_91], %195 {strides = array<i32>} : memref<1x8x32xf32, #tpu.memory_space<vmem>>, vector<1x8x32xf32>,
    } else {
    }
    return
  }
  func.func @transform_0(%arg0: i32, %arg1: i32) -> (i32, i32, i32) {
    %c0_i32 = arith.constant 0 : i32
    %c0_i32_0 = arith.constant 0 : i32
    %c0_i32_1 = arith.constant 0 : i32
    return %arg0, %c0_i32, %c0_i32_0 : i32, i32, i32
  }
  func.func @transform_1(%arg0: i32, %arg1: i32) -> (i32, i32, i32) {
    %c0_i32 = arith.constant 0 : i32
    %c0_i32_0 = arith.constant 0 : i32
    %c0_i32_1 = arith.constant 0 : i32
    return %arg1, %c0_i32, %c0_i32_0 : i32, i32, i32
  }
  func.func @transform_2(%arg0: i32, %arg1: i32) -> (i32, i32, i32) {
    %c0_i32 = arith.constant 0 : i32
    %c0_i32_0 = arith.constant 0 : i32
    %c0_i32_1 = arith.constant 0 : i32
    return %arg1, %c0_i32, %c0_i32_0 : i32, i32, i32
  }
  func.func @transform_3(%arg0: i32, %arg1: i32) -> (i32, i32, i32) {
    %c0_i32 = arith.constant 0 : i32
    %c0_i32_0 = arith.constant 0 : i32
    %c0_i32_1 = arith.constant 0 : i32
    return %arg1, %c0_i32, %c0_i32_0 : i32, i32, i32
  }
  func.func @transform_4(%arg0: i32, %arg1: i32) -> (i32, i32, i32) {
    %c0_i32 = arith.constant 0 : i32
    %c0_i32_0 = arith.constant 0 : i32
    %c0_i32_1 = arith.constant 0 : i32
    return %arg1, %c0_i32, %c0_i32_0 : i32, i32, i32
  }
  func.func @transform_5(%arg0: i32, %arg1: i32) -> (i32, i32, i32) {
    %c0_i32 = arith.constant 0 : i32
    %c0_i32_0 = arith.constant 0 : i32
    %c0_i32_1 = arith.constant 0 : i32
    return %arg1, %c0_i32, %c0_i32_0 : i32, i32, i32
  }
  func.func @transform_6(%arg0: i32, %arg1: i32) -> (i32, i32, i32) {
    %c0_i32 = arith.constant 0 : i32
    %c0_i32_0 = arith.constant 0 : i32
    %c0_i32_1 = arith.constant 0 : i32
    return %arg1, %c0_i32, %c0_i32_0 : i32, i32, i32
  }
  func.func @transform_7(%arg0: i32, %arg1: i32) -> (i32, i32, i32) {
    %c0_i32 = arith.constant 0 : i32
    %c0_i32_0 = arith.constant 0 : i32
    %c0_i32_1 = arith.constant 0 : i32
    return %arg1, %c0_i32, %c0_i32_0 : i32, i32, i32
  }
  func.func @transform_8(%arg0: i32, %arg1: i32) -> (i32, i32, i32) {
    %c0_i32 = arith.constant 0 : i32
    %c0_i32_0 = arith.constant 0 : i32
    %c0_i32_1 = arith.constant 0 : i32
    return %arg1, %c0_i32, %c0_i32_0 : i32, i32, i32
  }
  func.func @transform_9(%arg0: i32, %arg1: i32) -> (i32, i32, i32) {
    %c0_i32 = arith.constant 0 : i32
    %c0_i32_0 = arith.constant 0 : i32
    %c0_i32_1 = arith.constant 0 : i32
    return %arg1, %c0_i32, %c0_i32_0 : i32, i32, i32
  }
  func.func @transform_10(%arg0: i32, %arg1: i32) -> (i32, i32, i32) {
    %c0_i32 = arith.constant 0 : i32
    %c0_i32_0 = arith.constant 0 : i32
    %c0_i32_1 = arith.constant 0 : i32
    return %arg1, %c0_i32, %c0_i32_0 : i32, i32, i32
  }
  func.func @transform_11(%arg0: i32, %arg1: i32) -> (i32, i32, i32) {
    %c0_i32 = arith.constant 0 : i32
    %c0_i32_0 = arith.constant 0 : i32
    %c0_i32_1 = arith.constant 0 : i32
    return %arg1, %c0_i32, %c0_i32_0 : i32, i32, i32
  }
  func.func @transform_12(%arg0: i32, %arg1: i32) -> (i32, i32, i32) {
    %c0_i32 = arith.constant 0 : i32
    %c0_i32_0 = arith.constant 0 : i32
    %c0_i32_1 = arith.constant 0 : i32
    return %arg1, %c0_i32, %c0_i32_0 : i32, i32, i32
  }
  func.func @transform_13(%arg0: i32, %arg1: i32) -> (i32, i32, i32) {
    %c0_i32 = arith.constant 0 : i32
    %c0_i32_0 = arith.constant 0 : i32
    %c0_i32_1 = arith.constant 0 : i32
    return %arg0, %c0_i32, %c0_i32_0 : i32, i32, i32
  }
}

</mosaic_0001>

<bundles_post_ra>
// kernel: tpu_custom_call.1
= control target key start
LH: loop header
LB: loop body
LE: loop exit
PB: predicated region body
PF: predicated region fallthrough
CT: control target
= control target key end

     0   :  { %s2517_s0 = inlined_call_operand.hbm [shape: f32[2,8,32], index: 0, kind: input, shape index: {}]   ;;  %s2518_s1 = inlined_call_operand.vmem [shape: f32[2,32,96], index: 1, kind: input, shape index: {}]   ;;  %s2519_s2 = inlined_call_operand.hbm [shape: f32[2,1,96], index: 2, kind: input, shape index: {}]   ;;  %s2520_s3 = inlined_call_operand.vmem [shape: f32[2,32,32], index: 3, kind: input, shape index: {}]   ;;  %s2521_s4 = inlined_call_operand.vmem [shape: f32[2,1,32], index: 4, kind: input, shape index: {}]   ;;  %s2522_s5 = inlined_call_operand.hbm [shape: f32[2,1,32], index: 5, kind: input, shape index: {}]   ;;  %s2523_s6 = inlined_call_operand.vmem [shape: f32[2,1,32], index: 6, kind: input, shape index: {}]   ;;  %s2524_s7 = inlined_call_operand.vmem [shape: f32[2,32,64], index: 7, kind: input, shape index: {}]   ;;  %s2525_s8 = inlined_call_operand.hbm [shape: f32[2,1,64], index: 8, kind: input, shape index: {}]   ;;  %s2526_s9 = inlined_call_operand.vmem [shape: f32[2,64,32], index: 9, kind: input, shape index: {}]   ;;  %s2527_s10 = inlined_call_operand.vmem [shape: f32[2,1,32], index: 10, kind: input, shape index: {}]   ;;  %s2528_s11 = inlined_call_operand.vmem [shape: f32[2,1,32], index: 11, kind: input, shape index: {}]   ;;  %s2529_s12 = inlined_call_operand.vmem [shape: f32[2,1,32], index: 12, kind: input, shape index: {}]   ;;  %s2530_s13 = inlined_call_operand.hbm [shape: f32[2,8,32], index: 13, kind: output, shape index: {}]  }
   0x1   :  { %2544 = sst [smem:[#allocation29_spill]] %s2517_s0 }
   0x2   :  { %2545 = sst [smem:[#allocation30_spill]] %s2518_s1 }
   0x3   :  { %2546 = sst [smem:[#allocation31_spill]] %s2519_s2 }
   0x4   :  { %2547 = sst [smem:[#allocation32_spill]] %s2520_s3 }
   0x5   :  { %2548 = sst [smem:[#allocation33_spill]] %s2522_s5 }
   0x6   :  { %2549 = sst [smem:[#allocation34_spill]] %s2523_s6 }
   0x7   :  { %2550 = sst [smem:[#allocation35_spill]] %s2524_s7 }
   0x8   :  { %2551 = sst [smem:[#allocation36_spill]] %s2525_s8 }
   0x9   :  { %2552 = sst [smem:[#allocation37_spill]] %s2526_s9 }
   0xa   :  { %2553 = sst [smem:[#allocation38_spill]] %s2527_s10 }
   0xb   :  { %2554 = sst [smem:[#allocation39_spill]] %s2528_s11 }
   0xc   :  { %2555 = sst [smem:[#allocation40_spill]] %s2529_s12 }
   0xd   :  { %2556 = sst [smem:[#allocation41_spill]] %s2530_s13 }
   0xe   :  { %18 = vsyncpa [#allocation4], 0 }
   0xf   :  { %20 = vsyncpa [#allocation4 + $0x1], 0 }
  0x10   :  { %21 = vsyncpa [#allocation7], 0 }
  0x11   :  { %23 = vsyncpa [#allocation7 + $0x1], 0 }
  0x12   :  { %24 = vsyncpa [#allocation10], 0 }
  0x13   :  { %26 = vsyncpa [#allocation10 + $0x1], 0 }
  0x14   :  { %27 = vsyncpa [#allocation5], 0 }
  0x15   :  { %29 = vsyncpa [#allocation5 + $0x1], 0  ;;  %s2102_s25 = smov 0   ;;  %s2104_s26 = smov 0  }
  0x16   :  { %s2106_s27 = smov 0   ;;  %s2108_s28 = smov 0  }
  0x17   :  { %s2110_s29 = smov 0   ;;  %s2112_s30 = smov 0  }
  0x18   :  { %s2114_s14 = smov 0   ;;  %s2116_s15 = smov 0  }
  0x19   :  { %s2118_s16 = smov 0   ;;  %s2120_s17 = smov 0  }
  0x1a   :  { %s2122_s18 = smov 0  }
  0x1b LB: > { %2557 = sst [smem:[#allocation16_spill]] %s1983_s27  ;;  %s2156_s19 = sadd.s32 4294967295, %s2015_s18   ;;  %s2015_s18 = sphi %s2122_s18, %s35_s18   ;;  %s2011_s17 = sphi %s2120_s17, %s2614_s17   ;;  %s2007_s16 = sphi %s2118_s16, %s2613_s16   ;;  %s2003_s15 = sphi %s2116_s15, %s2612_s15   ;;  %s1999_s14 = sphi %s2114_s14, %s2611_s14   ;;  %s1995_s30 = sphi %s2112_s30, %s2610_s30   ;;  %s1991_s29 = sphi %s2110_s29, %s2609_s29   ;;  %s1987_s28 = sphi %s2108_s28, %s2608_s28   ;;  %s1983_s27 = sphi %s2106_s27, %s2607_s27   ;;  %s1979_s26 = sphi %s2104_s26, %s2616_s26   ;;  %s1975_s25 = sphi %s2102_s25, %s2615_s25  }
  0x1c   : > { %2558 = sst [smem:[#allocation17_spill]] %s1987_s28  ;;  %s44_s20 = sadd.s32 1, %s2007_s16 }
  0x1d   : > { %2559 = sst [smem:[#allocation18_spill]] %s1991_s29  ;;  %p2159_p0 = scmp.ge.s32.totalorder %s44_s20, 2 }
  0x1e   : > { %2560 = sst [smem:[#allocation19_spill]] %s1995_s30  ;;  %p62_p1 = scmp.eq.s32.totalorder %s2015_s18, 0 }
  0x1f   : > { %2561 = sst [smem:[#allocation20_spill]] %s2003_s15  ;;  %p68_p2 = scmp.eq.s32.totalorder %s2156_s19, 0 }
  0x20   : > { %2562 = sst [smem:[#allocation21_spill]] %s2007_s16  ;;  %s106_s22 = sadd.s32 1, %s1983_s27 }
  0x21   : > { %2563 = sst [smem:[#allocation22_spill]] %s2011_s17  ;;  %s2618_s20 = smov (%p2159_p0, %s44_s20), 0 }
  0x22   : > { %2565 = sst [smem:[#allocation23_spill]] %s2618_s20  ;;  %p113_p3 = scmp.ne.s32.totalorder %s1983_s27, %s1979_s26 }
  0x23   : > { %p119_p4 = scmp.ne.s32.totalorder %s1979_s26, %s1975_s25  ;;  %s103_s23 = ssub.s32 %s2007_s16, %s2618_s20 }
  0x24   : > { %p104_p5 = scmp.eq.s32.totalorder %s103_s23, 0  ;;  %p115_p6 = por %p113_p3, %p62_p1 }
  0x25   : > { %p2179_p7 = por %p119_p4, %p68_p2  ;;  %p1626_p8 = scmp.lt.s32.totalorder %s2015_s18, 4 }
  0x26   : > { %s2185_s13 = scalar_select %p104_p5, %s1983_s27, %s106_s22  }
  0x27   : > { %s456_s15 = sand.u32 1, %s2015_s18   ;;  %s2189_s25 = sand.u32 1, %s1983_s27  }
  0x28   : > { %2567 = sst [smem:[#allocation24_spill]] %s2185_s13  ;;  %s459_s11 = scalar_lea.vmem [#allocation6], %s2189_s25 }
  0x29   : > { %s2568_s2 = sld [smem:[#allocation31_spill]]  ;;  %s466_s9 = sshll.u32 %s459_s11, 4  ;;  %s467_s9 = int_to_ptr.vmem [resolvable:$true] %s466_s9 }
  0x2a   : > { %p2198_p9 = pnand %p1626_p8, %p115_p6  ;;  %p1562_p10 = scmp.ge.s32.totalorder %s2015_s18, 1 }
  0x2b   : > { %p559_p11 = scmp.lt.s32.totalorder %s2015_s18, 5  ;;  %s2204_s12 = scalar_lea.sflag [#allocation7], %s456_s15 }
  0x2c   : > { %s1557_s20 = sadd.s32 4294967294, %s2015_s18   ;;  %p61_p13 = scmp.ne.s32.totalorder %s1995_s30, %s1991_s29 }
  0x2d   : > { %p2209_p12 = pnand %p1562_p10, %p559_p11  ;;  %p67_p4 = scmp.ne.s32.totalorder %s1991_s29, %s1987_s28 }
  0x2e   : > { %p2225_p5 = por %p62_p1, %p61_p13  ;;  %p403_p6 = scmp.eq.s32.totalorder %s2156_s19, 3 }
  0x2f   : > { %s462_s23 = scalar_lea.hbm %s2568_s2, %s2007_s16  ;;  %s54_s2 = sadd.s32 1, %s1995_s30 }
  0x30   : > { %s464_s22 = sshll.u32 %s462_s23, 4  ;;  %s47_s23 = sadd.s32 1, %s2011_s17  ;;  %s465_s22 = int_to_ptr.hbm [resolvable:$true] %s464_s22 }
  0x31   : > { %1615 = dma.hbm_to_vmem [thread:$0]  (!%p2198_p9), %s465_s22, 16, %s467_s9, %s2204_s12  }
  0x32   : > { %s2620_s23 = smov (!%p2159_p0, %s47_s23), %s2011_s17  ;;  %p2234_p10 = por %p68_p2, %p67_p4 }
  0x33   : > { %p49_p3 = scmp.ge.s32.totalorder %s2620_s23, 2  ;;  %p2238_p0 = por %p403_p6, %p61_p13 }
  0x34   : > { %p409_p1 = scmp.eq.s32.totalorder %s1557_s20, 3  ;;  %s429_s27 = sand.u32 1, %s1995_s30  }
  0x35   : > { %s2622_s23 = smov (%p49_p3, %s2620_s23), 0  ;;  %s1560_s7 = sshll.u32 %s429_s27, 3 }
  0x36   : > { %2572 = sst [smem:[#allocation25_spill]] %s2622_s23  ;;  %s51_s22 = ssub.s32 %s2011_s17, %s2622_s23 }
  0x37   : > { %s2574_s21 = scalar_select %p2238_p0, 1, 0 }
  0x38   : > { %p52_p11 = scmp.eq.s32.totalorder %s51_s22, 0  ;;  %p2245_p3 = por %p409_p1, %p67_p4 }
  0x39   : > { %2575 = sst [smem:[#allocation26_spill]] %s2574_s21  ;;  %s1561_s6 = sshll.u32 %s2011_s17, 3 }
  0x3a   : > { %s2576_s28 = scalar_select %p2245_p3, 1, 0 }
  0x3b   : > { %s2250_s10 = scalar_select %p52_p11, %s1995_s30, %s54_s2  }
  0x3c   : > { %2577 = sst [smem:[#allocation27_spill]] %s2576_s28  ;;  %s433_s20 = scalar_lea.vmem [#allocation3], %s1560_s7 }
  0x3d   : > { %2578 = sst [smem:[#allocation28_spill]] %s2250_s10  ;;  %s441_s22 = sshll.u32 %s433_s20, 4  ;;  %s442_s22 = int_to_ptr.vmem [resolvable:$true] %s441_s22 }
  0x3e   : > { %s2579_s0 = sld [smem:[#allocation29_spill]]  ;;  %p1610_p2 = pnand %p1626_p8, %p2225_p5 }
  0x3f   : > { %s2580_s5 = sld [smem:[#allocation33_spill]]  ;;  %s490_s1 = scalar_lea.vmem [#allocation8], %s2189_s25 }
  0x40   : > { %s497_s3 = sshll.u32 %s490_s1, 4  ;;  %s2581_s8 = sld [smem:[#allocation36_spill]]  ;;  %s498_s3 = int_to_ptr.vmem [resolvable:$true] %s497_s3 }
  0x41   : > { %s521_s20 = scalar_lea.vmem [#allocation9], %s2189_s25  ;;  %s519_s10 = scalar_lea.sflag [#allocation10], %s2189_s25 }
  0x44   : > { %s437_s21 = scalar_lea.hbm %s2579_s0, %s1561_s6  ;;  %s430_s6 = scalar_lea.sflag [#allocation4], %s429_s27 }
  0x45   : > { %s439_s23 = sshll.u32 %s437_s21, 4  ;;  %s493_s17 = scalar_lea.hbm %s2580_s5, %s2007_s16  ;;  %s440_s23 = int_to_ptr.hbm [resolvable:$true] %s439_s23 }
  0x46   : > { %s495_s30 = sshll.u32 %s493_s17, 4  ;;  %s524_s15 = scalar_lea.hbm %s2581_s8, %s2007_s16  ;;  %s496_s30 = int_to_ptr.hbm [resolvable:$true] %s495_s30 }
  0x47   : > { %1612 = dma.hbm_to_vmem [thread:$0]  (!%p1610_p2), %s440_s23, 128, %s442_s22, %s430_s6  }
  0x48   : > { %1618 = dma.hbm_to_vmem [thread:$0]  (!%p2198_p9), %s496_s30, 16, %s498_s3, %s2204_s12  }
  0x49   : > { %s528_s0 = sshll.u32 %s521_s20, 4  ;;  %s526_s28 = sshll.u32 %s524_s15, 4  ;;  %s529_s0 = int_to_ptr.vmem [resolvable:$true] %s528_s0  ;;  %s527_s28 = int_to_ptr.hbm [resolvable:$true] %s526_s28 }
  0x4a   : > { %1621 = dma.hbm_to_vmem [thread:$0]  (!%p2198_p9), %s527_s28, 16, %s529_s0, %s519_s10  }
  0x4b   : > { %563 = sbr.rel (%p2209_p12) target bundleno = 2425 (0x979), region = 72  ;;  %s2279_s27 = sand.u32 (!%p2209_p12), 1, %s1991_s29  }
  0x4c   : > { %s2541_s30 = sshll.u32 (!%p2209_p12), %s2279_s27, 3  ;;  %s566_s17 = scalar_lea.sflag (!%p2209_p12), [#allocation4], %s2279_s27 }
  0x4d   : > { %s569_s12 = scalar_lea.vmem (!%p2209_p12), [#allocation3], %s2541_s30 }
  0x50   : > { %1958 = dma.done.wait (%p2234_p10), %s566_s17, 128  }
  0x51   : > { %1960 = vsyncadd (%p2234_p10), %s566_s17, 4294967168  ;;  %s575_s0 = sand.u32 1, %s2156_s19   ;;  %s2291_s13 = sand.u32 1, %s1979_s26  }
  0x52   : > { %s576_s28 = scalar_lea.sflag [#allocation7], %s575_s0 }
  0x53   : > { %1962 = dma.done.wait (%p2179_p7), %s576_s28, 32  }
  0x54   : > { %1964 = vsyncadd (%p2179_p7), %s576_s28, 4294967264  ;;  %s594_s23 = scalar_lea.sflag [#allocation10], %s2291_s13 }
  0x55   : > { %1966 = dma.done.wait (%p2179_p7), %s594_s23, 16  }
  0x56   : > { %1968 = vsyncadd (%p2179_p7), %s594_s23, 4294967280  ;;  %p687_p8 = scmp.lt.s32.totalorder %s1999_s14, 1  ;;  %s2582_s7 = sld [smem:[#allocation30_spill]] }
  0x57   : > { %s2583_s10 = sld [smem:[#allocation32_spill]]  ;;  %p1573_p7 = scmp.ne.s32.totalorder %s1999_s14, 0 }
  0x58   : > { %s2307_s19 = scalar_select %p687_p8, %s1999_s14, 1 }
  0x59   : > { %s2585_s30 = sld [smem:[#allocation35_spill]] }
  0x5a   : > { %s1595_s22 = sshll.u32 %s2307_s19, 5  ;;  %s1598_s2 = sshll.u32 %s2307_s19, 6 }
  0x5b   : > { %s2586_s8 = sld [smem:[#allocation38_spill]] }
  0x5c   : > { %s691_s21 = scalar_lea.vmem %s2582_s7, %s1595_s22  ;;  %s2587_s16 = sld [smem:[#allocation37_spill]] }
  0x5d   : > { %s2320_s17 = scalar_lea.vmem %s2583_s10, %s1595_s22  ;;  %s2588_s29 = sld [smem:[#allocation39_spill]] }
  0x5e   : > { %s2589_s9 = sld [smem:[#allocation40_spill]] }
  0x5f   : > { %s2329_s5 = scalar_lea.vmem %s2585_s30, %s1595_s22  ;;  %s2590_s30 = sshll.u32 %s2279_s27, 3 }
  0x60   : > { %s2351_s11 = scalar_lea.vmem [#allocation11], %s2590_s30  ;;  %725 = sbr.rel (%p1573_p7) target bundleno = 103 (0x67), region = 92 }
  0x61   : > { %s715_s24 = scalar_lea.vmem %s2586_s8, %s2307_s19 }
  0x62   : > { %s2339_s15 = scalar_lea.vmem %s2587_s16, %s1598_s2 }
  0x63   : > { %s718_s0 = scalar_lea.vmem %s2588_s29, %s2307_s19 }
  0x64   : > { %s721_s25 = scalar_lea.vmem %s2589_s9, %s2307_s19 }
  0x65   : > { %v726_v0 = vld [vmem:[%s569_s12] sm:$0xff]  ;;  %vm727_vm0 = vcmask 261120  }
  0x66   : > { %728 = vst.msk [vmem:[#allocation2] sm:$0xff] %vm727_vm0, %v726_v0 }
  0x67 PF: > { %v733_v1 = vld [vmem:[%s691_s21 + $0x18] sm:$0xff]  ;;  %v732_v2 = vld [vmem:[%s691_s21 + $0x10] sm:$0xff]  ;;  %v731_v3 = vld [vmem:[%s691_s21 + $0x8] sm:$0xff]  ;;  %vm761_vm1 = vcmask 261120   ;;  %s2591_s8 = scalar_lea.vmem [#allocation6], %s2291_s13  ;;  %s2017_s29 = smov 64  }
  0x68   : > { %777 = vmatpush.msra.mxu0 %v733_v1  ;;  %v730_v4 = vld [vmem:[%s691_s21] sm:$0xff]  ;;  %s2018_s16 = smov 120   ;;  %s2019_s12 = smov 96   ;;  %vm788_vm2 = vcmask 64512  }
  0x69   : > { %v1731_v6 = vld [vmem:[%s2591_s8] ss:$0 sm:$0xff]  ;;  %s2020_s9 = smov 56   ;;  %s2021_s22 = smov 88  }
  0x6a   : > { %778 = vmatpush.msra.mxu0 %v732_v2  ;;  %s2022_s3 = smov 104   ;;  %s2023_s21 = smov 72  }
  0x6b   : > { %s2024_s2 = smov 80   ;;  %s2025_s1 = smov 112  }
  0x6c   : > { %779 = vmatpush.msra.mxu0 %v731_v3  ;;  %s2026_s6 = smov 40   ;;  %s2027_s7 = smov 8  }
  0x6d   : > { %v2354_v5 = vld [vmem:[#allocation2] sm:$0xff]  ;;  %s2028_s20 = smov 48   ;;  %s2029_s10 = smov 16  }
  0x6e   : > { %780 = vmatpush.msra.mxu0 %v730_v4  ;;  %s2030_s28 = smov 24   ;;  %s2592_s8 = scalar_lea.vmem %s2521_s4, %s2307_s19 }
  0x6f   : > { %1574 = vmatmul.msk.f32.vlgmr.msra.gmra.mxu0 %vm761_vm1, %v2354_v5  ;;  %p1590_p9 = scmp.ne.s32.totalorder %s1999_s14, 1 }
  0xec   : > { %v782_v7 = vpop.f32.mrf.mxu0 }
  0xed   : > { %v2360_v8 = vadd.f32 %v1731_v6, %v782_v7 }
  0xef   : > { %838 = vrot.lane.b32.xlu2 %v2360_v8, %s2017_s29  ;;  %864 = vrot.lane.b32.xlu1 %v2360_v8, %s2018_s16  ;;  %s2594_s16 = sld [smem:[#allocation34_spill]] }
  0xf0   : > { %786 = vrot.lane.b32.xlu0 %v2360_v8, %s2019_s12 }
  0xf5   : > { %s2595_s12 = scalar_lea.vmem %s2594_s16, %s2307_s19 }
  0xf7   : > { %917 = vrot.lane.b32.xlu2 %v2360_v8, %s2020_s9  ;;  %s2596_s9 = scalar_lea.vmem [#allocation9], %s2291_s13 }
  0xf8   : > { %866 = vrot.lane.b32.xlu0 %v2360_v8, %s2021_s22 }
 0x149   : > { %v839_v9 = vpop.permute.xlu2 %838 }
 0x14a   : > { %859 = vmatpush.msra.mxu2 %v839_v9 }
 0x151   : > { %v918_v10 = vpop.permute.xlu2 %917 }
 0x152   : > { %938 = vmatpush.msrb.mxu2 %v918_v10 }
 0x161   : > { %v865_v13 = vpop.permute.xlu1 %864 }
 0x162   : > { %v787_v11 = vpop.permute.xlu0 %786 }
 0x163   : > { %1575 = vmatpush.xpose.msk.msra.mxu1 %vm788_vm2, %v787_v11 }
 0x166   : > { %1576 = vmatmul.msk.f32.vlgmr.msra.gmra.mxu1 %vm788_vm2, %v2360_v8 }
 0x16a   : > { %v867_v12 = vpop.permute.xlu0 %866 }
 0x16b   : > { %1578 = vmatpush.xpose.msk.msra.mxu3 %vm788_vm2, %v867_v12 }
 0x16e   : > { %1579 = vmatmul.msk.f32.vlgmr.msra.gmra.mxu3 %vm788_vm2, %v865_v13 }
 0x1e3   : > { %v810_v14 = vpop.f32.mrf.mxu1 }
 0x1e4   : > { %v813_v15 = vmul.f32 0.35355338, %v810_v14 }
 0x1e6   : > { %v814_v16 = vsel %vm788_vm2, %v813_v15, -inf }
 0x1e7   : > { %815 = vmax.xlane.f32.xlu1 %v814_v16 }
 0x1f1   : > { %v889_v17 = vpop.f32.mrf.mxu3 }
 0x1f2   : > { %v892_v18 = vmul.f32 0.35355338, %v889_v17 }
 0x1f4   : > { %v893_v19 = vsel %vm788_vm2, %v892_v18, -inf }
 0x1f5   : > { %894 = vmax.xlane.f32.xlu2 %v893_v19 }
 0x200   : > { %1022 = vrot.lane.b32.xlu1 %v2360_v8, %s2022_s3 }
 0x20d   : > { %1024 = vrot.lane.b32.xlu2 %v2360_v8, %s2023_s21 }
 0x25a   : > { %v816_v20 = vpop.xlane.xlu1 %815 }
 0x25b   : > { %v817_v21 = vsub.f32 %v813_v15, %v816_v20 }
 0x25d   : > { %v818_v22 = vmul.f32 1.442695, %v817_v21 }
 0x25f   : > { %1739 = vpow2.f32 %v818_v22 }
 0x265   : > { %v1740_v23 = vpop.eup %1739 }
 0x266   : > { %v820_v24 = vsel %vm788_vm2, %v1740_v23, 0.0 }
 0x267   : > { %821 = vadd.xlane.f32.xlu2 %v820_v24 }
 0x268   : > { %v895_v25 = vpop.xlane.xlu2 %894 }
 0x269   : > { %v896_v26 = vsub.f32 %v892_v18, %v895_v25 }
 0x26b   : > { %v897_v27 = vmul.f32 1.442695, %v896_v26 }
 0x26d   : > { %1741 = vpow2.f32 %v897_v27 }
 0x270   : > { %v1025_v30 = vpop.permute.xlu2 %1024 }
 0x272   : > { %v1023_v57 = vpop.permute.xlu1 %1022 }
 0x273   : > { %v1742_v28 = vpop.eup %1741 }
 0x274   : > { %v899_v29 = vsel %vm788_vm2, %v1742_v28, 0.0 }
 0x275   : > { %900 = vadd.xlane.f32.xlu0 %v899_v29 }
 0x27f   : > { %945 = vrot.lane.b32.xlu2 %v2360_v8, %s2024_s2 }
 0x289   : > { %943 = vrot.lane.b32.xlu0 %v2360_v8, %s2025_s1 }
 0x2da   : > { %v822_v31 = vpop.xlane.xlu2 %821 }
 0x2db   : > { %1743 = vrcp.f32 %v822_v31  ;;  %v834_v36 = vand.u32 2147483648, %v822_v31  ;;  %v832_v38 = vand.u32 2147483647, %v822_v31  ;;  %vm828_vm4 = vweird.f32 %v822_v31 }
 0x2dd   : > { %v835_v41 = vor.u32 1.1754944e-38, %v834_v36  ;;  %vm833_vm6 = vcmp.eq.f32.partialorder %v832_v38, 8.507059e+37 }
 0x2e1   : > { %v1744_v32 = vpop.eup %1743 }
 0x2e2   : > { %v824_v33 = vmul.f32 %v1744_v32, %v822_v31  ;;  %v946_v34 = vpop.permute.xlu2 %945  ;;  %vm829_vm3 = vweird.f32 %v1744_v32 }
 0x2e3   : > { %1581 = vmatpush.xpose.msk.msrb.mxu1 %vm788_vm2, %v946_v34  ;;  %vm830_vm5 = vmor %vm828_vm4, %vm829_vm3 }
 0x2e4   : > { %v825_v35 = vsub.f32 1.0, %v824_v33 }
 0x2e6   : > { %v826_v37 = vmul.f32 %v1744_v32, %v825_v35 }
 0x2e8   : > { %v901_v39 = vpop.xlane.xlu0 %900  ;;  %v827_v40 = vadd.f32 %v1744_v32, %v826_v37 }
 0x2e9   : > { %1745 = vrcp.f32 %v901_v39  ;;  %v913_v48 = vand.u32 2147483648, %v901_v39  ;;  %v911_v50 = vand.u32 2147483647, %v901_v39  ;;  %vm907_vm8 = vweird.f32 %v901_v39 }
 0x2ea   : > { %v831_v42 = vsel %vm830_vm5, %v1744_v32, %v827_v40  ;;  %vm1114_vm5 = vcmask 130048  }
 0x2eb   : > { %v836_v43 = vsel %vm833_vm6, %v835_v41, %v831_v42  ;;  %v914_v52 = vor.u32 1.1754944e-38, %v913_v48  ;;  %vm912_vm10 = vcmp.eq.f32.partialorder %v911_v50, 8.507059e+37  ;;  %v738_v41 = vld [vmem:[%s2320_s17 + $0x18] sm:$0xff]  ;;  %v737_v42 = vld [vmem:[%s2320_s17 + $0x10] sm:$0xff]  ;;  %vm1116_vm6 = vcmask 195584  }
 0x2ec   : > { %v837_v44 = vmul.f32 %v1740_v23, %v836_v43  ;;  %1136 = vmatpush.msra.mxu1 %v738_v41  ;;  %v736_v43 = vld [vmem:[%s2320_s17 + $0x8] sm:$0xff] }
 0x2ee   : > { %1577 = vmatmul.msk.f32.vlgmr.msra.gmra.mxu2 %vm788_vm2, %v837_v44  ;;  %1137 = vmatpush.msra.mxu1 %v737_v42  ;;  %v735_v44 = vld [vmem:[%s2320_s17] sm:$0xff]  ;;  %s2593_s17 = scalar_lea.vmem [#allocation8], %s2291_s13  ;;  %v748_v42 = vld [vmem:[%s2339_s15 + $0x8] sm:$0xff] }
 0x2ef   : > { %v1746_v45 = vpop.eup %1745  ;;  %1584 = vmatpush.xpose.msk.msra.mxu2 %vm788_vm2, %v1025_v30 }
 0x2f0   : > { %v903_v46 = vmul.f32 %v1746_v45, %v901_v39  ;;  %vm908_vm7 = vweird.f32 %v1746_v45  ;;  %1138 = vmatpush.msra.mxu1 %v736_v43  ;;  %v747_v43 = vld [vmem:[%s2339_s15] sm:$0xff] }
 0x2f1   : > { %vm909_vm9 = vmor %vm907_vm8, %vm908_vm7 }
 0x2f2   : > { %v904_v47 = vsub.f32 1.0, %v903_v46  ;;  %1139 = vmatpush.msra.mxu1 %v735_v44 }
 0x2f4   : > { %v905_v49 = vmul.f32 %v1746_v45, %v904_v47 }
 0x2f6   : > { %v906_v51 = vadd.f32 %v1746_v45, %v905_v49 }
 0x2f8   : > { %v910_v53 = vsel %vm909_vm9, %v1746_v45, %v906_v51  ;;  %v1732_v51 = vld [vmem:[%s2592_s8] ss:$0 sm:$0xff] }
 0x2f9   : > { %v915_v54 = vsel %vm912_vm10, %v914_v52, %v910_v53 }
 0x2fa   : > { %v916_v55 = vmul.f32 %v1742_v28, %v915_v54 }
 0x2fb   : > { %v944_v56 = vpop.permute.xlu0 %943 }
 0x2fc   : > { %1580 = vmatmul.msk.f32.vlgmr.msrb.gmra.mxu2 %vm788_vm2, %v916_v55  ;;  %1582 = vmatmul.msk.f32.vlgmr.msrb.gmra.mxu1 %vm788_vm2, %v944_v56  ;;  %v2031_v56 = vmov 32.0  }
 0x304   : > { %1585 = vmatmul.msk.f32.vlgmr.msra.gmra.mxu2 %vm788_vm2, %v1023_v57 }
 0x371   : > { %v2386_v58 = vpop.f32.mrf.mxu2 }
 0x379   : > { %v968_v59 = vpop.f32.mrf.mxu1 }
 0x37a   : > { %v971_v60 = vmul.f32 0.35355338, %v968_v59 }
 0x37c   : > { %v972_v61 = vsel %vm788_vm2, %v971_v60, -inf }
 0x37d   : > { %973 = vmax.xlane.f32.xlu2 %v972_v61 }
 0x37f   : > { %v940_v62 = vpop.f32.mrf.mxu2 }
 0x387   : > { %v1047_v63 = vpop.f32.mrf.mxu2 }
 0x388   : > { %v1050_v0 = vmul.f32 0.35355338, %v1047_v63 }
 0x38a   : > { %v1051_v1 = vsel %vm788_vm2, %v1050_v0, -inf }
 0x38b   : > { %1052 = vmax.xlane.f32.xlu1 %v1051_v1 }
 0x3a4   : > { %1075 = vrot.lane.b32.xlu1 %v2360_v8, %s2026_s6 }
 0x3f0   : > { %v974_v2 = vpop.xlane.xlu2 %973 }
 0x3f1   : > { %v975_v3 = vsub.f32 %v971_v60, %v974_v2 }
 0x3f3   : > { %v976_v4 = vmul.f32 1.442695, %v975_v3  ;;  %v745_v3 = vld [vmem:[%s2329_s5 + $0x18] sm:$0xff] }
 0x3f5   : > { %1747 = vpow2.f32 %v976_v4  ;;  %v744_v4 = vld [vmem:[%s2329_s5 + $0x10] sm:$0xff] }
 0x3fb   : > { %v1748_v6 = vpop.eup %1747 }
 0x3fc   : > { %v978_v7 = vsel %vm788_vm2, %v1748_v6, 0.0 }
 0x3fd   : > { %979 = vadd.xlane.f32.xlu0 %v978_v7  ;;  %v742_v7 = vld [vmem:[%s2329_s5] sm:$0xff] }
 0x3fe   : > { %v1053_v9 = vpop.xlane.xlu1 %1052 }
 0x3ff   : > { %v1054_v10 = vsub.f32 %v1050_v0, %v1053_v9 }
 0x401   : > { %v1055_v11 = vmul.f32 1.442695, %v1054_v10 }
 0x403   : > { %1749 = vpow2.f32 %v1055_v11 }
 0x409   : > { %v1750_v12 = vpop.eup %1749 }
 0x40a   : > { %v1057_v13 = vsel %vm788_vm2, %v1750_v12, 0.0 }
 0x40b   : > { %1058 = vadd.xlane.f32.xlu2 %v1057_v13 }
 0x411   : > { %1102 = vrot.lane.b32.xlu0 %v940_v62, %s2027_s7 }
 0x416   : > { %v1076_v14 = vpop.permute.xlu1 %1075 }
 0x417   : > { %1096 = vmatpush.msrb.mxu2 %v1076_v14 }
 0x423   : > { %996 = vrot.lane.b32.xlu2 %v2360_v8, %s2028_s20 }
 0x470   : > { %v980_v15 = vpop.xlane.xlu0 %979 }
 0x471   : > { %1751 = vrcp.f32 %v980_v15  ;;  %v992_v20 = vand.u32 2147483648, %v980_v15  ;;  %vm986_vm12 = vweird.f32 %v980_v15  ;;  %v990_v22 = vand.u32 2147483647, %v980_v15 }
 0x473   : > { %v993_v25 = vor.u32 1.1754944e-38, %v992_v20  ;;  %vm991_vm14 = vcmp.eq.f32.partialorder %v990_v22, 8.507059e+37 }
 0x477   : > { %v1752_v16 = vpop.eup %1751 }
 0x478   : > { %v982_v17 = vmul.f32 %v1752_v16, %v980_v15  ;;  %vm987_vm11 = vweird.f32 %v1752_v16 }
 0x479   : > { %vm988_vm13 = vmor %vm986_vm12, %vm987_vm11 }
 0x47a   : > { %v983_v18 = vsub.f32 1.0, %v982_v17 }
 0x47c   : > { %v984_v19 = vmul.f32 %v1752_v16, %v983_v18  ;;  %v1733_v18 = vld [vmem:[%s2593_s17] ss:$0 sm:$0xff] }
 0x47e   : > { %v985_v21 = vadd.f32 %v1752_v16, %v984_v19  ;;  %v1059_v23 = vpop.xlane.xlu2 %1058 }
 0x47f   : > { %1753 = vrcp.f32 %v1059_v23  ;;  %v1071_v31 = vand.u32 2147483648, %v1059_v23  ;;  %v1069_v33 = vand.u32 2147483647, %v1059_v23  ;;  %vm1065_vm0 = vweird.f32 %v1059_v23 }
 0x480   : > { %v989_v24 = vsel %vm988_vm13, %v1752_v16, %v985_v21  ;;  %1755 = vrcp.f32 %v2031_v56  ;;  %v1734_v21 = vld [vmem:[%s2595_s12] ss:$0 sm:$0xff] }
 0x481   : > { %v994_v26 = vsel %vm991_vm14, %v993_v25, %v989_v24  ;;  %v1072_v35 = vor.u32 1.1754944e-38, %v1071_v31  ;;  %vm1070_vm4 = vcmp.eq.f32.partialorder %v1069_v33, 8.507059e+37  ;;  %v1735_v24 = vld [vmem:[%s2596_s9] ss:$0 sm:$0xff]  ;;  %v753_v31 = vld [vmem:[%s2339_s15 + $0x30] sm:$0xff] }
 0x482   : > { %v995_v29 = vmul.f32 %v1748_v6, %v994_v26  ;;  %v743_v6 = vld [vmem:[%s2329_s5 + $0x8] sm:$0xff]  ;;  %v751_v33 = vld [vmem:[%s2339_s15 + $0x20] sm:$0xff] }
 0x483   : > { %v1103_v45 = vpop.permute.xlu0 %1102 }
 0x484   : > { %v1113_v47 = vsel %vm788_vm2, %v2386_v58, %v1103_v45 }
 0x485   : > { %v1754_v27 = vpop.eup %1753 }
 0x486   : > { %v1061_v8 = vmul.f32 %v1754_v27, %v1059_v23  ;;  %v997_v28 = vpop.permute.xlu2 %996  ;;  %vm1066_vm15 = vweird.f32 %v1754_v27  ;;  %v1756_v57 = vpop.eup %1755 }
 0x487   : > { %1017 = vmatpush.msrb.mxu3 %v997_v28  ;;  %vm1067_vm3 = vmor %vm1065_vm0, %vm1066_vm15  ;;  %v1149_v58 = vmul.f32 32.0, %v1756_v57  ;;  %vm1251_vm15 = vcmask 523264  }
 0x488   : > { %v1062_v30 = vsub.f32 1.0, %v1061_v8  ;;  %1583 = vmatmul.msk.f32.vlgmr.msrb.gmra.mxu3 %vm788_vm2, %v995_v29 }
 0x489   : > { %v1150_v59 = vsub.f32 1.0, %v1149_v58  ;;  %1200 = vmatpush.msra.mxu3 %v745_v3 }
 0x48a   : > { %v1063_v32 = vmul.f32 %v1754_v27, %v1062_v30  ;;  %v754_v30 = vld [vmem:[%s2339_s15 + $0x38] sm:$0xff] }
 0x48b   : > { %v1151_v60 = vmul.f32 %v1756_v57, %v1150_v59  ;;  %1201 = vmatpush.msra.mxu3 %v744_v4  ;;  %1263 = vmatpush.msrb.mxu0 %v754_v30  ;;  %v1736_v4 = vld [vmem:[%s715_s24] ss:$0 sm:$0xff] }
 0x48c   : > { %v1064_v34 = vadd.f32 %v1754_v27, %v1063_v32  ;;  %v752_v32 = vld [vmem:[%s2339_s15 + $0x28] sm:$0xff] }
 0x48d   : > { %v1152_v61 = vadd.f32 %v1756_v57, %v1151_v60  ;;  %1202 = vmatpush.msra.mxu3 %v743_v6  ;;  %1264 = vmatpush.msrb.mxu0 %v753_v31 }
 0x48e   : > { %v1068_v36 = vsel %vm1067_vm3, %v1754_v27, %v1064_v34 }
 0x48f   : > { %v1073_v37 = vsel %vm1070_vm4, %v1072_v35, %v1068_v36  ;;  %1203 = vmatpush.msra.mxu3 %v742_v7  ;;  %1265 = vmatpush.msrb.mxu0 %v752_v32  ;;  %v750_v36 = vld [vmem:[%s2339_s15 + $0x18] sm:$0xff] }
 0x490   : > { %v1074_v38 = vmul.f32 %v1750_v12, %v1073_v37 }
 0x491   : > { %1266 = vmatpush.msrb.mxu0 %v751_v33 }
 0x492   : > { %1586 = vmatmul.msk.f32.vlgmr.msrb.gmra.mxu2 %vm788_vm2, %v1074_v38  ;;  %vm1153_vm2 = vweird.f32 %v1756_v57  ;;  %v749_v38 = vld [vmem:[%s2339_s15 + $0x10] sm:$0xff] }
 0x493   : > { %v2410_v62 = vsel %vm1153_vm2, %v1756_v57, %v1152_v61  ;;  %1267 = vmatpush.msrb.mxu0 %v750_v36 }
 0x495   : > { %1268 = vmatpush.msrb.mxu0 %v749_v38 }
 0x497   : > { %1269 = vmatpush.msrb.mxu0 %v748_v42 }
 0x499   : > { %1270 = vmatpush.msrb.mxu0 %v747_v43 }
 0x50b   : > { %v1019_v39 = vpop.f32.mrf.mxu3 }
 0x50c   : > { %1106 = vrot.lane.b32.xlu2 %v1019_v39, %s2029_s10 }
 0x515   : > { %v1098_v40 = vpop.f32.mrf.mxu2 }
 0x516   : > { %1110 = vrot.lane.b32.xlu0 %v1098_v40, %s2030_s28 }
 0x566   : > { %v1107_v46 = vpop.permute.xlu2 %1106 }
 0x567   : > { %v1115_v48 = vsel %vm1114_vm5, %v1113_v47, %v1107_v46 }
 0x588   : > { %v1111_v49 = vpop.permute.xlu0 %1110 }
 0x589   : > { %v1117_v50 = vsel %vm1116_vm6, %v1115_v48, %v1111_v49 }
 0x58a   : > { %1587 = vmatmul.msk.f32.vlgmr.msra.gmra.mxu1 %vm761_vm1, %v1117_v50 }
 0x607   : > { %v1141_v52 = vpop.f32.mrf.mxu1 }
 0x608   : > { %v1142_v53 = vadd.f32 %v1732_v51, %v1141_v52 }
 0x60a   : > { %v1144_v54 = vadd.f32 %v1142_v53, %v2354_v5 }
 0x60c   : > { %v1145_v55 = vsel %vm761_vm1, %v1144_v54, 0.0 }
 0x60d   : > { %1146 = vadd.xlane.f32.xlu1 %v1145_v55 }
 0x680   : > { %v1147_v63 = vpop.xlane.xlu1 %1146 }
 0x681   : > { %v1155_v5 = vmul.f32 %v2410_v62, %v1147_v63 }
 0x683   : > { %v1156_v0 = vsub.f32 %v1144_v54, %v1155_v5 }
 0x685   : > { %v1157_v1 = vmul.f32 %v1156_v0, %v1156_v0 }
 0x687   : > { %v1158_v2 = vsel %vm761_vm1, %v1157_v1, 0.0 }
 0x688   : > { %1159 = vadd.xlane.f32.xlu2 %v1158_v2 }
 0x6fb   : > { %v1160_v9 = vpop.xlane.xlu2 %1159 }
 0x6fc   : > { %v1161_v10 = vmul.f32 %v1160_v9, %v2410_v62 }
 0x6fe   : > { %v1162_v11 = vadd.f32 1e-06, %v1161_v10 }
 0x700   : > { %1757 = vrsqrt.f32 %v1162_v11  ;;  %vm1169_vm8 = vweird.f32 %v1162_v11 }
 0x706   : > { %v1758_v12 = vpop.eup %1757 }
 0x707   : > { %v1164_v13 = vmul.f32 %v1758_v12, %v1162_v11  ;;  %vm1170_vm7 = vweird.f32 %v1758_v12 }
 0x708   : > { %vm1171_vm9 = vmor %vm1169_vm8, %vm1170_vm7 }
 0x709   : > { %v1165_v14 = vmul.f32 %v1758_v12, %v1164_v13 }
 0x70b   : > { %v1166_v15 = vmul.f32 0.5, %v1165_v14 }
 0x70d   : > { %v1167_v16 = vsub.f32 1.5, %v1166_v15 }
 0x70f   : > { %v1168_v17 = vmul.f32 %v1758_v12, %v1167_v16 }
 0x711   : > { %v1172_v19 = vsel %vm1171_vm9, %v1758_v12, %v1168_v17 }
 0x712   : > { %v1173_v20 = vmul.f32 %v1172_v19, %v1156_v0 }
 0x714   : > { %v1177_v22 = vmul.f32 %v1733_v18, %v1173_v20 }
 0x716   : > { %v2426_v23 = vadd.f32 %v1734_v21, %v1177_v22 }
 0x718   : > { %1588 = vmatmul.msk.f32.vlgmr.msra.gmra.mxu3 %vm761_vm1, %v2426_v23 }
 0x79b   : > { %v1205_v25 = vpop.f32.mrf.mxu3 }
 0x79c   : > { %v1206_v26 = vadd.f32 %v1735_v24, %v1205_v25  ;;  %v1737_v25 = vld [vmem:[%s718_s0] ss:$0 sm:$0xff] }
 0x79e   : > { %v1209_v27 = vmul.f32 0.70710677, %v1206_v26  ;;  %v1208_v1 = vmul.f32 0.5, %v1206_v26 }
 0x7a0   : > { %v1210_v8 = vand.u32 2147483647, %v1209_v27  ;;  %vm1243_vm14 = vcmp.lt.f32.partialorder %v1209_v27, 0.0 }
 0x7a2   : > { %v1211_v28 = vmul.f32 0.3275911, %v1210_v8  ;;  %v1237_v48 = vmul.f32 %v1210_v8, %v1210_v8 }
 0x7a4   : > { %v1212_v29 = vadd.f32 1.0, %v1211_v28  ;;  %v1238_v51 = vsub.f32 0.0, %v1237_v48 }
 0x7a6   : > { %1759 = vrcp.f32 %v1212_v29  ;;  %v1224_v39 = vand.u32 2147483648, %v1212_v29  ;;  %v1222_v41 = vand.u32 2147483647, %v1212_v29  ;;  %vm1218_vm11 = vweird.f32 %v1212_v29 }
 0x7a7   : > { %v1239_v54 = vmul.f32 1.442695, %v1238_v51 }
 0x7a8   : > { %v1225_v45 = vor.u32 1.1754944e-38, %v1224_v39  ;;  %vm1223_vm13 = vcmp.eq.f32.partialorder %v1222_v41, 8.507059e+37 }
 0x7a9   : > { %1761 = vpow2.f32 %v1239_v54 }
 0x7ac   : > { %v1760_v34 = vpop.eup %1759 }
 0x7ad   : > { %v1214_v35 = vmul.f32 %v1760_v34, %v1212_v29  ;;  %vm1219_vm10 = vweird.f32 %v1760_v34 }
 0x7ae   : > { %vm1220_vm12 = vmor %vm1218_vm11, %vm1219_vm10 }
 0x7af   : > { %v1215_v37 = vsub.f32 1.0, %v1214_v35  ;;  %v1762_v60 = vpop.eup %1761 }
 0x7b1   : > { %v1216_v40 = vmul.f32 %v1760_v34, %v1215_v37 }
 0x7b3   : > { %v1217_v44 = vadd.f32 %v1760_v34, %v1216_v40 }
 0x7b5   : > { %v1221_v46 = vsel %vm1220_vm12, %v1760_v34, %v1217_v44 }
 0x7b6   : > { %v1226_v47 = vsel %vm1223_vm13, %v1225_v45, %v1221_v46 }
 0x7b7   : > { %v1228_v49 = vmul.f32 1.0614054, %v1226_v47 }
 0x7b9   : > { %v1229_v50 = vadd.f32 -1.4531521, %v1228_v49 }
 0x7bb   : > { %v1230_v52 = vmul.f32 %v1229_v50, %v1226_v47 }
 0x7bd   : > { %v1231_v53 = vadd.f32 1.4214138, %v1230_v52 }
 0x7bf   : > { %v1232_v55 = vmul.f32 %v1231_v53, %v1226_v47 }
 0x7c1   : > { %v1233_v56 = vadd.f32 -0.28449672, %v1232_v55 }
 0x7c3   : > { %v1234_v57 = vmul.f32 %v1233_v56, %v1226_v47 }
 0x7c5   : > { %v1235_v58 = vadd.f32 0.2548296, %v1234_v57 }
 0x7c7   : > { %v1236_v59 = vmul.f32 %v1235_v58, %v1226_v47 }
 0x7c9   : > { %v1241_v61 = vmul.f32 %v1762_v60, %v1236_v59 }
 0x7cb   : > { %v1242_v63 = vsub.f32 1.0, %v1241_v61 }
 0x7cd   : > { %v1244_v5 = vsub.f32 0.0, %v1242_v63 }
 0x7cf   : > { %v1245_v0 = vsel %vm1243_vm14, %v1244_v5, %v1242_v63 }
 0x7d0   : > { %v1246_v2 = vadd.f32 1.0, %v1245_v0 }
 0x7d2   : > { %v1247_v3 = vmul.f32 %v1246_v2, %v1208_v1 }
 0x7d4   : > { %1589 = vmatmul.msk.f32.vlgmr.msrb.gmra.mxu0 %vm1251_vm15, %v1247_v3 }
 0x851   : > { %v1272_v6 = vpop.f32.mrf.mxu0 }
 0x852   : > { %v1273_v7 = vadd.f32 %v1736_v4, %v1272_v6 }
 0x854   : > { %v1275_v9 = vadd.f32 %v1273_v7, %v2426_v23 }
 0x856   : > { %v1276_v10 = vsel %vm761_vm1, %v1275_v9, 0.0 }
 0x857   : > { %1277 = vadd.xlane.f32.xlu0 %v1276_v10 }
 0x8ca   : > { %v1278_v11 = vpop.xlane.xlu0 %1277 }
 0x8cb   : > { %v1279_v12 = vmul.f32 %v1278_v11, %v2410_v62 }
 0x8cd   : > { %v1280_v13 = vsub.f32 %v1275_v9, %v1279_v12 }
 0x8cf   : > { %v1281_v14 = vmul.f32 %v1280_v13, %v1280_v13 }
 0x8d1   : > { %v1282_v15 = vsel %vm761_vm1, %v1281_v14, 0.0 }
 0x8d2   : > { %1283 = vadd.xlane.f32.xlu1 %v1282_v15 }
 0x945   : > { %v1284_v16 = vpop.xlane.xlu1 %1283 }
 0x946   : > { %v1285_v17 = vmul.f32 %v1284_v16, %v2410_v62  ;;  %v1738_v62 = vld [vmem:[%s721_s25] ss:$0 sm:$0xff] }
 0x948   : > { %v1286_v18 = vadd.f32 1e-06, %v1285_v17 }
 0x94a   : > { %1763 = vrsqrt.f32 %v1286_v18  ;;  %vm1293_vm3 = vweird.f32 %v1286_v18 }
 0x950   : > { %v1764_v19 = vpop.eup %1763 }
 0x951   : > { %v1288_v20 = vmul.f32 %v1764_v19, %v1286_v18  ;;  %vm1294_vm0 = vweird.f32 %v1764_v19 }
 0x952   : > { %vm1295_vm4 = vmor %vm1293_vm3, %vm1294_vm0 }
 0x953   : > { %v1289_v21 = vmul.f32 %v1764_v19, %v1288_v20 }
 0x955   : > { %v1290_v22 = vmul.f32 0.5, %v1289_v21 }
 0x957   : > { %v1291_v23 = vsub.f32 1.5, %v1290_v22 }
 0x959   : > { %v1292_v24 = vmul.f32 %v1764_v19, %v1291_v23 }
 0x95b   : > { %v1296_v26 = vsel %vm1295_vm4, %v1764_v19, %v1292_v24 }
 0x95c   : > { %v1297_v27 = vmul.f32 %v1296_v26, %v1280_v13 }
 0x95e   : > { %v1301_v8 = vmul.f32 %v1737_v25, %v1297_v27  ;;  %1310 = sbr.rel (%p1590_p9) target bundleno = 2404 (0x964), region = 96 }
 0x960   : > { %v1305_v28 = vadd.f32 %v1738_v62, %v1301_v8 }
 0x962   : > { %1306 = vst.msk [vmem:[#allocation2] sm:$0xff] %vm761_vm1, %v1305_v28 }
 0x963   : > { %1311 = vst.msk [vmem:[%s2351_s11] sm:$0xff] %vm761_vm1, %v1305_v28 }
 0x964 PF: > { %s2600_s0 = sld [smem:[#allocation20_spill]]  ;;  %s1325_s30 = sshll.u32 %s2351_s11, 4  ;;  %s1326_s30 = int_to_ptr.vmem [resolvable:$true] %s1325_s30 }
 0x965   : > { %s2602_s25 = sld [smem:[#allocation41_spill]]  ;;  %s1313_s17 = scalar_lea.sflag [#allocation5], %s2279_s27 }
 0x96a   : > { %s1592_s20 = sshll.u32 %s2600_s0, 3 }
 0x96b   : > { %s2603_s23 = smov %s2602_s25  ;;  %s1323_s28 = scalar_lea.hbm %s2602_s25, %s1592_s20 }
 0x96c   : > { %s1327_s8 = sshll.u32 %s1323_s28, 4  ;;  %s1905_s12 = scalar_lea.hbm %s2603_s23, 16  ;;  %s1328_s8 = int_to_ptr.hbm [resolvable:$true] %s1327_s8 }
 0x96d   : > { %s1899_s14 = sshra.s32 %s1328_s8, 4  ;;  %s1900_s14 = int_to_ptr.hbm [resolvable:$true] %s1899_s14 }
 0x96e   : > { %s1901_s5 = scalar_lea.hbm %s1900_s14, 8  ;;  %p1906_p5 = scmp.lt.s32.totalorder %s1900_s14, %s2603_s23 }
 0x96f   : > { %p1902_p12 = scmp.ne.s32.totalorder %s1900_s14, %s1901_s5  ;;  %p1907_p6 = scmp.lt.s32.totalorder %s1905_s12, %s1901_s5 }
 0x971   : > { %p1903_p13 = pnand %p1902_p12, %p2238_p0  ;;  %p1908_p10 = por %p1907_p6, %p1906_p5 }
 0x973   : > { %p1904_p4 = pneg %p1903_p13 }
 0x975   : > { %p1909_p1 = pnand %p1908_p10, %p1904_p4 }
 0x977   : > { %1912 = shalt.err (!%p1909_p1)
}
 0x978   : > { %1607 = dma.vmem_to_hbm [thread:$0]  (%p2238_p0), %s1326_s30, 128, %s1328_s8, %s1313_s17  }
 0x979 PF: > { %s2604_s27 = sld [smem:[#allocation17_spill]]  ;;  %p1627_p11 = scmp.ge.s32.totalorder %s2015_s18, 2 }
 0x97b   : > { %p1623_p2 = pnand %p1627_p11, %p2245_p3 }
 0x97d   : > { %p1624_p8 = pneg %p1623_p2 }
 0x97f   : > { %s1339_s15 = sand.u32 1, %s2604_s27  }
 0x980   : > { %s1340_s22 = scalar_lea.sflag [#allocation5], %s1339_s15 }
 0x981   : > { %1970 = dma.done.wait (%p1624_p8), %s1340_s22, 128  }
 0x982   : > { %1972 = vsyncadd (%p1624_p8), %s1340_s22, 4294967168  ;;  %s35_s18 = sadd.s32 1, %s2015_s18   ;;  %s2606_s24 = sld [smem:[#allocation16_spill]] }
 0x983   : > { %p32_p7 = scmp.ge.s32.totalorder %s35_s18, 6   ;;  %s2607_s27 = sld [smem:[#allocation24_spill]] }
 0x984   : > { %s2608_s28 = sld [smem:[#allocation18_spill]]  ;;  %s2615_s25 = smov %s1979_s26 }
 0x985   : > { %s2609_s29 = sld [smem:[#allocation19_spill]] }
 0x986   : > { %s2610_s30 = sld [smem:[#allocation28_spill]]  ;;  %34 = sbr.rel (!%p32_p7) target bundleno = 27 (0x1b), region = 189 }
 0x987   : > { %s2611_s14 = sld [smem:[#allocation21_spill]] }
 0x988   : > { %s2612_s15 = sld [smem:[#allocation22_spill]]  ;;  %s2616_s26 = smov %s2606_s24 }
 0x989   : > { %s2613_s16 = sld [smem:[#allocation23_spill]] }
 0x98a   : > { %s2614_s17 = sld [smem:[#allocation25_spill]] }
 0x98b   :  { %1346 = vsyncpa [#allocation4], 1 }
 0x98c   :  { %1348 = vsyncpa [#allocation4 + $0x1], 1 }
 0x98d   :  { %1349 = vsyncpa [#allocation7], 1 }
 0x98e   :  { %1351 = vsyncpa [#allocation7 + $0x1], 1 }
 0x98f   :  { %1352 = vsyncpa [#allocation10], 1 }
 0x990   :  { %1354 = vsyncpa [#allocation10 + $0x1], 1 }
 0x991   :  { %1355 = vsyncpa [#allocation5], 1 }
 0x992   :  { %1357 = vsyncpa [#allocation5 + $0x1], 1 }

</bundles_post_ra>
